<compile_context>
chip_gen: v6e
topology: v6e:2x2x1
jax: 0.10.0
libtpu: 0.0.40
codegen_flags: <defaults>
</compile_context>

<pallas_src>
import functools

import jax
import jax.numpy as jnp
from jax import lax
from jax.experimental import pallas as pl
from jax.experimental.pallas import tpu as pltpu


def _round_up(x, m):
    return -(-x // m) * m


def _conv_block_kernel(x_ref, w_ref, scale_ref, shift_ref, o_ref, *,
                       kh, kw, rt, ow, c_pad, stride, dilation):
    # x_ref:     (1, 1, RT_IN, WP, Cpad)  bf16 row band incl. (kh-1)*dilation halo
    # w_ref:     (KH*KW, Cpad, OCpad)     bf16 per-tap weight matrices
    # scale_ref: (1, OCpad) f32           gamma / sqrt(var + eps)
    # shift_ref: (1, OCpad) f32           beta - mean * scale
    # o_ref:     (1, 1, RT*OW, OCpad)     output tile (bf16 by default), lane-dense
    oc_pad = o_ref.shape[-1]
    m = rt * ow

    x3 = x_ref[0, 0]                                  # (RT_IN, WP, Cpad)

    acc = jnp.zeros((m, oc_pad), jnp.float32)
    for i in range(kh):
        r0 = i * dilation
        for j in range(kw):
            c0 = j * dilation
            if stride == 1:
                win = x3[r0:r0 + rt, c0:c0 + ow, :]                    # (RT, OW, Cpad)
            else:
                # TODO(synk): stride>1 tap extraction uses strided static slices and is
                # functional but unexercised / unoptimized in this test.
                win = x3[r0:r0 + (rt - 1) * stride + 1:stride,
                         c0:c0 + (ow - 1) * stride + 1:stride, :]
            acc = acc + jnp.dot(win.reshape(m, c_pad), w_ref[i * kw + j],
                                preferred_element_type=jnp.float32)

    y = jnp.maximum(acc, 0.0)                          # ReLU
    y = y * scale_ref[...] + shift_ref[...]            # folded inference BatchNorm
    # Dropout (eval mode) is identity.
    o_ref[0, 0] = y.astype(o_ref.dtype)


def _choose_row_tile(oh, ow, wp, c_pad, oc_pad, kh, kw, stride, dilation,
                     in_bytes, out_bytes, budget_bytes):
    """Largest output-row tile whose double-buffered blocks fit the VMEM budget."""
    sub_in = 16 if in_bytes == 2 else 8
    sub_out = 16 if out_bytes == 2 else 8

    def vmem_need(rt):
        rt_in = (rt - 1) * stride + dilation * (kh - 1) + 1
        # VMEM pipeline buffers are stored lane/sublane padded.
        in_blk = rt_in * _round_up(wp, sub_in) * _round_up(c_pad, 128) * in_bytes
        out_blk = _round_up(rt * ow, sub_out) * oc_pad * out_bytes
        acc_blk = _round_up(rt * ow, 8) * oc_pad * 4
        w_blk = kh * kw * _round_up(c_pad, sub_in) * oc_pad * in_bytes
        # 2x (double buffer) for the streamed blocks + one transient block copy + acc.
        return 2 * (in_blk + out_blk) + in_blk + acc_blk + w_blk

    cap = oh if oh <= 8 else -(-oh // 2)      # >=2 row steps once images are not tiny
    while cap > 1 and vmem_need(cap) > budget_bytes:
        cap -= 1
    rt = next(d for d in range(cap, 0, -1) if oh % d == 0)   # prefer exact tiling
    if rt < min(cap, 8):                      # only tiny divisors -> accept ragged tail
        rt = cap
    return rt


def conv2d_block_nhwc(x_nhwc, conv_weight, gamma, beta, run_mean, run_var,
                      *, stride=1, padding=0, dilation=1, eps=1e-5,
                      compute_dtype=jnp.bfloat16, out_dtype=None,
                      keep_padded_channels=False):
    """Fused Conv2d(no bias)+ReLU+BN(inference)+Dropout(eval). Returns (N, OH, OW, OC)."""
    oc, ic, kh, kw = conv_weight.shape
    n, h, w, c = x_nhwc.shape
    assert c == ic, (c, ic)
    if out_dtype is None:
        out_dtype = compute_dtype

    oh = (h + 2 * padding - dilation * (kh - 1) - 1) // stride + 1
    ow = (w + 2 * padding - dilation * (kw - 1) - 1) // stride + 1
    assert oh > 0 and ow > 0, (oh, ow)

    in_bytes = jnp.dtype(compute_dtype).itemsize
    out_bytes = jnp.dtype(out_dtype).itemsize
    calign = 16 if in_bytes == 2 else 8
    c_pad = max(calign, _round_up(ic, calign))       # sublane-aligned contraction dim
    oc_pad = _round_up(oc, 128)                       # lane-dense MXU / store columns

    hp, wp = h + 2 * padding, w + 2 * padding

    # ~24 MiB of streamed blocks keeps 2x(in)+2x(out)+temps well under v7x's 64 MiB VMEM;
    # v5e/v6e (128 MiB) could take larger tiles - tune budget/vmem_limit per generation.
    rt = _choose_row_tile(oh, ow, wp, c_pad, oc_pad, kh, kw, stride, dilation,
                          in_bytes, out_bytes, budget_bytes=24 * 1024 * 1024)
    nt = -(-oh // rt)
    oh_pad = nt * rt
    rt_in = (rt - 1) * stride + dilation * (kh - 1) + 1
    hp_need = (oh_pad - 1) * stride + dilation * (kh - 1) + 1

    # ---- glue (one fused HBM pass): bf16 cast, spatial + channel zero-pad, and the
    # halo-inclusive row-band gather so the kernel only needs Blocked indexing.
    x_p = jnp.pad(x_nhwc.astype(compute_dtype),
                  ((0, 0),
                   (padding, padding + max(0, hp_need - hp)),
                   (padding, padding),
                   (0, c_pad - ic)))
    row_idx = jnp.arange(nt)[:, None] * (rt * stride) + jnp.arange(rt_in)[None, :]
    x_tiles = x_p[:, row_idx]                         # (n, nt, rt_in, wp, c_pad)

    # weight (OC, IC, KH, KW) -> (KH*KW, Cpad, OCpad); padded rows/cols are zero.
    w_t = jnp.transpose(conv_weight, (2, 3, 1, 0))
    w_t = jnp.pad(w_t, ((0, 0), (0, 0), (0, c_pad - ic), (0, oc_pad - oc)))
    w_mat = w_t.reshape(kh * kw, c_pad, oc_pad).astype(compute_dtype)

    # BatchNorm (inference) folded into a per-channel affine, kept in f32.
    scale = gamma.astype(jnp.float32) / jnp.sqrt(run_var.astype(jnp.float32) + eps)
    shift = beta.astype(jnp.float32) - run_mean.astype(jnp.float32) * scale
    scale = jnp.pad(scale, (0, oc_pad - oc)).reshape(1, oc_pad)
    shift = jnp.pad(shift, (0, oc_pad - oc)).reshape(1, oc_pad)

    kernel = functools.partial(_conv_block_kernel, kh=kh, kw=kw, rt=rt, ow=ow,
                               c_pad=c_pad, stride=stride, dilation=dilation)

    out = pl.pallas_call(
        kernel,
        out_shape=jax.ShapeDtypeStruct((n, nt, rt * ow, oc_pad), out_dtype),
        grid_spec=pltpu.PrefetchScalarGridSpec(
            num_scalar_prefetch=0,
            grid=(n, nt),
            in_specs=[
                pl.BlockSpec((1, 1, rt_in, wp, c_pad), lambda b, r: (b, r, 0, 0, 0)),
                pl.BlockSpec((kh * kw, c_pad, oc_pad), lambda b, r: (0, 0, 0)),
                pl.BlockSpec((1, oc_pad), lambda b, r: (0, 0)),
                pl.BlockSpec((1, oc_pad), lambda b, r: (0, 0)),
            ],
            out_specs=pl.BlockSpec((1, 1, rt * ow, oc_pad), lambda b, r: (b, r, 0, 0)),
        ),
        compiler_params=pltpu.CompilerParams(
            dimension_semantics=("parallel", "parallel"),
            vmem_limit_bytes=48 * 1024 * 1024,   # <= v7x's 64 MiB physical VMEM
        ),
    )(x_tiles, w_mat, scale, shift)

    out = out.reshape(n, oh_pad, ow, oc_pad)          # contiguous -> free reshape
    if oh_pad != oh:
        out = out[:, :oh]
    if not keep_padded_channels and oc_pad != oc:
        out = out[..., :oc]
    return out


@functools.partial(jax.jit, static_argnames=("stride", "padding", "dilation",
                                              "compute_dtype", "out_dtype"))
def conv2d_block(x_nchw, conv_weight, gamma, beta, run_mean, run_var,
                 *, stride=1, padding=0, dilation=1, eps=1e-5,
                 compute_dtype=jnp.bfloat16, out_dtype=None):
    """NCHW interface matching the PyTorch module (eval mode).

    Prefer conv2d_block_nhwc(..., keep_padded_channels=True) end-to-end across layers:
    the NCHW<->NHWC transposes and the channel-pad slice here are extra HBM passes
    outside the kernel pipeline (the slice at least fuses with the transpose).
    """
    x_nhwc = jnp.transpose(x_nchw, (0, 2, 3, 1))
    y = conv2d_block_nhwc(x_nhwc, conv_weight, gamma, beta, run_mean, run_var,
                          stride=stride, padding=padding, dilation=dilation, eps=eps,
                          compute_dtype=compute_dtype, out_dtype=out_dtype,
                          keep_padded_channels=True)
    oc = conv_weight.shape[0]
    return jnp.transpose(y[..., :oc], (0, 3, 1, 2))


def _reference(x_nchw, conv_weight, gamma, beta, run_mean, run_var,
               *, stride=1, padding=0, dilation=1, eps=1e-5,
               compute_dtype=jnp.bfloat16):
    # Match the kernel's bf16 MXU operands: round inputs to bf16, accumulate in f32.
    xq = x_nchw.astype(compute_dtype).astype(jnp.float32)
    wq = conv_weight.astype(compute_dtype).astype(jnp.float32)
    y = lax.conv_general_dilated(
        xq, wq,
        window_strides=(stride, stride),
        padding=[(padding, padding), (padding, padding)],
        rhs_dilation=(dilation, dilation),
        dimension_numbers=("NCHW", "OIHW", "NCHW"),
        preferred_element_type=jnp.float32)
    y = jnp.maximum(y, 0.0)
    s = gamma / jnp.sqrt(run_var + eps)
    b = beta - run_mean * s
    return y * s[None, :, None, None] + b[None, :, None, None]


if __name__ == "__main__":
    key = jax.random.PRNGKey(0)
    k_x, k_w, k_g, k_b, k_m, k_v = jax.random.split(key, 6)

    # Module config: Conv2dBlock(in_channels=4, out_channels=8, kernel_size=3,
    #                            padding=0, stride=1, dilation=1), eval mode.
    N, C, H, W = 2, 4, 16, 16
    OC, KH, KW = 8, 3, 3

    x = jax.random.normal(k_x, (N, C, H, W), dtype=jnp.float32)
    conv_w = 0.1 * jax.random.normal(k_w, (OC, C, KH, KW), dtype=jnp.float32)
    gamma = 1.0 + 0.1 * jax.random.normal(k_g, (OC,), dtype=jnp.float32)
    beta = 0.1 * jax.random.normal(k_b, (OC,), dtype=jnp.float32)
    run_mean = 0.05 * jax.random.normal(k_m, (OC,), dtype=jnp.float32)
    run_var = 1.0 + 0.1 * jnp.abs(jax.random.normal(k_v, (OC,), dtype=jnp.float32))

    out = conv2d_block(x, conv_w, gamma, beta, run_mean, run_var,
                       stride=1, padding=0, dilation=1)
    out = jax.block_until_ready(out)

    ref = _reference(x, conv_w, gamma, beta, run_mean, run_var,
                     stride=1, padding=0, dilation=1)
    assert out.shape == (N, OC, H - KH + 1, W - KW + 1), out.shape

    out_f32 = out.astype(jnp.float32)
    max_err = float(jnp.max(jnp.abs(out_f32 - ref)))
    # bf16 writeback => ~0.4% relative rounding on top of the bf16-operand conv.
    assert jnp.allclose(out_f32, ref, atol=2e-2, rtol=2e-2), (
        "mismatch vs reference, max abs err = %f" % max_err)

    print("KERNEL_OK")
</pallas_src>

<mosaic_0001>
module attributes {stable_mosaic.version = 11 : i64} {
  func.func @_conv_block_kernel(%arg0: i32, %arg1: i32, %arg2: memref<1x1x9x16x16xbf16, #tpu.memory_space<vmem>>, %arg3: memref<9x16x128xbf16, #tpu.memory_space<vmem>>, %arg4: memref<1x128xf32, #tpu.memory_space<vmem>>, %arg5: memref<1x128xf32, #tpu.memory_space<vmem>>, %arg6: memref<1x1x98x128xbf16, #tpu.memory_space<vmem>>) attributes {dimension_semantics = [#tpu.dimension_semantics<parallel>, #tpu.dimension_semantics<parallel>], iteration_bounds = array<i64: 2, 2>, scalar_prefetch = 0 : i64, scratch_operands = 0 : i64, tpu.core_type = #tpu.core_type<tc>, window_params = [{transform_indices = @transform_0, window_bounds = array<i64: 1, 1, 9, 16, 16>}, {pipeline_mode = #tpu.pipeline_mode<synchronous>, transform_indices = @transform_1, window_bounds = array<i64: 9, 16, 128>}, {pipeline_mode = #tpu.pipeline_mode<synchronous>, transform_indices = @transform_2, window_bounds = array<i64: 1, 128>}, {pipeline_mode = #tpu.pipeline_mode<synchronous>, transform_indices = @transform_3, window_bounds = array<i64: 1, 128>}, {transform_indices = @transform_4, window_bounds = array<i64: 1, 1, 98, 128>}]} {
    %c0 = arith.constant 0 : index
    %c0_0 = arith.constant 0 : index
    %c0_1 = arith.constant 0 : index
    %c0_2 = arith.constant 0 : index
    %c0_3 = arith.constant 0 : index
    %0 = vector.load %arg2[%c0, %c0_0, %c0_1, %c0_2, %c0_3] : memref<1x1x9x16x16xbf16, #tpu.memory_space<vmem>>, vector<1x1x9x16x16xbf16>
    %1 = vector.shape_cast %0 : vector<1x1x9x16x16xbf16> to vector<9x16x16xbf16>
    %cst = arith.constant 0.000000e+00 : f32
    %2 = vector.broadcast %cst : f32 to vector<98x128xf32>
    %3 = vector.extract_strided_slice %1 {offsets = [0, 0, 0], sizes = [7, 14, 16], strides = [1, 1, 1]} : vector<9x16x16xbf16> to vector<7x14x16xbf16>
    %4 = vector.shape_cast %3 : vector<7x14x16xbf16> to vector<98x16xbf16>
    %c0_4 = arith.constant 0 : index
    %c0_5 = arith.constant 0 : index
    %c0_6 = arith.constant 0 : index
    %5 = vector.load %arg3[%c0_4, %c0_5, %c0_6] : memref<9x16x128xbf16, #tpu.memory_space<vmem>>, vector<1x16x128xbf16>
    %6 = vector.shape_cast %5 : vector<1x16x128xbf16> to vector<16x128xbf16>
    %cst_7 = arith.constant dense<0.000000e+00> : vector<98x128xf32>
    %7 = tpu.matmul %4, %6, %cst_7 {dimension_numbers = #tpu.dot_dimension_numbers<[1], [0], [0], [1], [0, 0, 1, 1], [], []>} : vector<98x16xbf16>, vector<16x128xbf16>, vector<98x128xf32> -> vector<98x128xf32>
    %8 = arith.addf %2, %7 : vector<98x128xf32>
    %9 = vector.extract_strided_slice %1 {offsets = [0, 1, 0], sizes = [7, 14, 16], strides = [1, 1, 1]} : vector<9x16x16xbf16> to vector<7x14x16xbf16>
    %10 = vector.shape_cast %9 : vector<7x14x16xbf16> to vector<98x16xbf16>
    %c1 = arith.constant 1 : index
    %c0_8 = arith.constant 0 : index
    %c0_9 = arith.constant 0 : index
    %11 = vector.load %arg3[%c1, %c0_8, %c0_9] : memref<9x16x128xbf16, #tpu.memory_space<vmem>>, vector<1x16x128xbf16>
    %12 = vector.shape_cast %11 : vector<1x16x128xbf16> to vector<16x128xbf16>
    %cst_10 = arith.constant dense<0.000000e+00> : vector<98x128xf32>
    %13 = tpu.matmul %10, %12, %cst_10 {dimension_numbers = #tpu.dot_dimension_numbers<[1], [0], [0], [1], [0, 0, 1, 1], [], []>} : vector<98x16xbf16>, vector<16x128xbf16>, vector<98x128xf32> -> vector<98x128xf32>
    %14 = arith.addf %8, %13 : vector<98x128xf32>
    %15 = vector.extract_strided_slice %1 {offsets = [0, 2, 0], sizes = [7, 14, 16], strides = [1, 1, 1]} : vector<9x16x16xbf16> to vector<7x14x16xbf16>
    %16 = vector.shape_cast %15 : vector<7x14x16xbf16> to vector<98x16xbf16>
    %c2 = arith.constant 2 : index
    %c0_11 = arith.constant 0 : index
    %c0_12 = arith.constant 0 : index
    %17 = vector.load %arg3[%c2, %c0_11, %c0_12] : memref<9x16x128xbf16, #tpu.memory_space<vmem>>, vector<1x16x128xbf16>
    %18 = vector.shape_cast %17 : vector<1x16x128xbf16> to vector<16x128xbf16>
    %cst_13 = arith.constant dense<0.000000e+00> : vector<98x128xf32>
    %19 = tpu.matmul %16, %18, %cst_13 {dimension_numbers = #tpu.dot_dimension_numbers<[1], [0], [0], [1], [0, 0, 1, 1], [], []>} : vector<98x16xbf16>, vector<16x128xbf16>, vector<98x128xf32> -> vector<98x128xf32>
    %20 = arith.addf %14, %19 : vector<98x128xf32>
    %21 = vector.extract_strided_slice %1 {offsets = [1, 0, 0], sizes = [7, 14, 16], strides = [1, 1, 1]} : vector<9x16x16xbf16> to vector<7x14x16xbf16>
    %22 = vector.shape_cast %21 : vector<7x14x16xbf16> to vector<98x16xbf16>
    %c3 = arith.constant 3 : index
    %c0_14 = arith.constant 0 : index
    %c0_15 = arith.constant 0 : index
    %23 = vector.load %arg3[%c3, %c0_14, %c0_15] : memref<9x16x128xbf16, #tpu.memory_space<vmem>>, vector<1x16x128xbf16>
    %24 = vector.shape_cast %23 : vector<1x16x128xbf16> to vector<16x128xbf16>
    %cst_16 = arith.constant dense<0.000000e+00> : vector<98x128xf32>
    %25 = tpu.matmul %22, %24, %cst_16 {dimension_numbers = #tpu.dot_dimension_numbers<[1], [0], [0], [1], [0, 0, 1, 1], [], []>} : vector<98x16xbf16>, vector<16x128xbf16>, vector<98x128xf32> -> vector<98x128xf32>
    %26 = arith.addf %20, %25 : vector<98x128xf32>
    %27 = vector.extract_strided_slice %1 {offsets = [1, 1, 0], sizes = [7, 14, 16], strides = [1, 1, 1]} : vector<9x16x16xbf16> to vector<7x14x16xbf16>
    %28 = vector.shape_cast %27 : vector<7x14x16xbf16> to vector<98x16xbf16>
    %c4 = arith.constant 4 : index
    %c0_17 = arith.constant 0 : index
    %c0_18 = arith.constant 0 : index
    %29 = vector.load %arg3[%c4, %c0_17, %c0_18] : memref<9x16x128xbf16, #tpu.memory_space<vmem>>, vector<1x16x128xbf16>
    %30 = vector.shape_cast %29 : vector<1x16x128xbf16> to vector<16x128xbf16>
    %cst_19 = arith.constant dense<0.000000e+00> : vector<98x128xf32>
    %31 = tpu.matmul %28, %30, %cst_19 {dimension_numbers = #tpu.dot_dimension_numbers<[1], [0], [0], [1], [0, 0, 1, 1], [], []>} : vector<98x16xbf16>, vector<16x128xbf16>, vector<98x128xf32> -> vector<98x128xf32>
    %32 = arith.addf %26, %31 : vector<98x128xf32>
    %33 = vector.extract_strided_slice %1 {offsets = [1, 2, 0], sizes = [7, 14, 16], strides = [1, 1, 1]} : vector<9x16x16xbf16> to vector<7x14x16xbf16>
    %34 = vector.shape_cast %33 : vector<7x14x16xbf16> to vector<98x16xbf16>
    %c5 = arith.constant 5 : index
    %c0_20 = arith.constant 0 : index
    %c0_21 = arith.constant 0 : index
    %35 = vector.load %arg3[%c5, %c0_20, %c0_21] : memref<9x16x128xbf16, #tpu.memory_space<vmem>>, vector<1x16x128xbf16>
    %36 = vector.shape_cast %35 : vector<1x16x128xbf16> to vector<16x128xbf16>
    %cst_22 = arith.constant dense<0.000000e+00> : vector<98x128xf32>
    %37 = tpu.matmul %34, %36, %cst_22 {dimension_numbers = #tpu.dot_dimension_numbers<[1], [0], [0], [1], [0, 0, 1, 1], [], []>} : vector<98x16xbf16>, vector<16x128xbf16>, vector<98x128xf32> -> vector<98x128xf32>
    %38 = arith.addf %32, %37 : vector<98x128xf32>
    %39 = vector.extract_strided_slice %1 {offsets = [2, 0, 0], sizes = [7, 14, 16], strides = [1, 1, 1]} : vector<9x16x16xbf16> to vector<7x14x16xbf16>
    %40 = vector.shape_cast %39 : vector<7x14x16xbf16> to vector<98x16xbf16>
    %c6 = arith.constant 6 : index
    %c0_23 = arith.constant 0 : index
    %c0_24 = arith.constant 0 : index
    %41 = vector.load %arg3[%c6, %c0_23, %c0_24] : memref<9x16x128xbf16, #tpu.memory_space<vmem>>, vector<1x16x128xbf16>
    %42 = vector.shape_cast %41 : vector<1x16x128xbf16> to vector<16x128xbf16>
    %cst_25 = arith.constant dense<0.000000e+00> : vector<98x128xf32>
    %43 = tpu.matmul %40, %42, %cst_25 {dimension_numbers = #tpu.dot_dimension_numbers<[1], [0], [0], [1], [0, 0, 1, 1], [], []>} : vector<98x16xbf16>, vector<16x128xbf16>, vector<98x128xf32> -> vector<98x128xf32>
    %44 = arith.addf %38, %43 : vector<98x128xf32>
    %45 = vector.extract_strided_slice %1 {offsets = [2, 1, 0], sizes = [7, 14, 16], strides = [1, 1, 1]} : vector<9x16x16xbf16> to vector<7x14x16xbf16>
    %46 = vector.shape_cast %45 : vector<7x14x16xbf16> to vector<98x16xbf16>
    %c7 = arith.constant 7 : index
    %c0_26 = arith.constant 0 : index
    %c0_27 = arith.constant 0 : index
    %47 = vector.load %arg3[%c7, %c0_26, %c0_27] : memref<9x16x128xbf16, #tpu.memory_space<vmem>>, vector<1x16x128xbf16>
    %48 = vector.shape_cast %47 : vector<1x16x128xbf16> to vector<16x128xbf16>
    %cst_28 = arith.constant dense<0.000000e+00> : vector<98x128xf32>
    %49 = tpu.matmul %46, %48, %cst_28 {dimension_numbers = #tpu.dot_dimension_numbers<[1], [0], [0], [1], [0, 0, 1, 1], [], []>} : vector<98x16xbf16>, vector<16x128xbf16>, vector<98x128xf32> -> vector<98x128xf32>
    %50 = arith.addf %44, %49 : vector<98x128xf32>
    %51 = vector.extract_strided_slice %1 {offsets = [2, 2, 0], sizes = [7, 14, 16], strides = [1, 1, 1]} : vector<9x16x16xbf16> to vector<7x14x16xbf16>
    %52 = vector.shape_cast %51 : vector<7x14x16xbf16> to vector<98x16xbf16>
    %c8 = arith.constant 8 : index
    %c0_29 = arith.constant 0 : index
    %c0_30 = arith.constant 0 : index
    %53 = vector.load %arg3[%c8, %c0_29, %c0_30] : memref<9x16x128xbf16, #tpu.memory_space<vmem>>, vector<1x16x128xbf16>
    %54 = vector.shape_cast %53 : vector<1x16x128xbf16> to vector<16x128xbf16>
    %cst_31 = arith.constant dense<0.000000e+00> : vector<98x128xf32>
    %55 = tpu.matmul %52, %54, %cst_31 {dimension_numbers = #tpu.dot_dimension_numbers<[1], [0], [0], [1], [0, 0, 1, 1], [], []>} : vector<98x16xbf16>, vector<16x128xbf16>, vector<98x128xf32> -> vector<98x128xf32>
    %56 = arith.addf %50, %55 : vector<98x128xf32>
    %cst_32 = arith.constant 0.000000e+00 : f32
    %57 = vector.broadcast %cst_32 : f32 to vector<98x128xf32>
    %58 = arith.maximumf %56, %57 : vector<98x128xf32>
    %c0_33 = arith.constant 0 : index
    %c0_34 = arith.constant 0 : index
    %59 = vector.load %arg4[%c0_33, %c0_34] : memref<1x128xf32, #tpu.memory_space<vmem>>, vector<1x128xf32>
    %60 = vector.broadcast %59 : vector<1x128xf32> to vector<98x128xf32>
    %61 = arith.mulf %58, %60 : vector<98x128xf32>
    %c0_35 = arith.constant 0 : index
    %c0_36 = arith.constant 0 : index
    %62 = vector.load %arg5[%c0_35, %c0_36] : memref<1x128xf32, #tpu.memory_space<vmem>>, vector<1x128xf32>
    %63 = vector.broadcast %62 : vector<1x128xf32> to vector<98x128xf32>
    %64 = arith.addf %61, %63 : vector<98x128xf32>
    %65 = arith.truncf %64 : vector<98x128xf32> to vector<98x128xbf16>
    %c0_37 = arith.constant 0 : index
    %c0_38 = arith.constant 0 : index
    %c0_39 = arith.constant 0 : index
    %c0_40 = arith.constant 0 : index
    %66 = vector.load %arg6[%c0_37, %c0_38, %c0_39, %c0_40] : memref<1x1x98x128xbf16, #tpu.memory_space<vmem>>, vector<1x1x98x128xbf16>
    %67 = vector.shape_cast %66 : vector<1x1x98x128xbf16> to vector<98x128xbf16>
    %68 = vector.shape_cast %65 : vector<98x128xbf16> to vector<1x1x98x128xbf16>
    tpu.vector_store %arg6[%c0_37, %c0_38, %c0_39, %c0_40], %68 {strides = array<i32>} : memref<1x1x98x128xbf16, #tpu.memory_space<vmem>>, vector<1x1x98x128xbf16>,
    return
  }
  func.func @transform_0(%arg0: i32, %arg1: i32) -> (i32, i32, i32, i32, i32) {
    %c0_i32 = arith.constant 0 : i32
    %c0_i32_0 = arith.constant 0 : i32
    %c0_i32_1 = arith.constant 0 : i32
    %c0_i32_2 = arith.constant 0 : i32
    return %arg0, %arg1, %c0_i32, %c0_i32_0, %c0_i32_1 : i32, i32, i32, i32, i32
  }
  func.func @transform_1(%arg0: i32, %arg1: i32) -> (i32, i32, i32) {
    %c0_i32 = arith.constant 0 : i32
    %c0_i32_0 = arith.constant 0 : i32
    %c0_i32_1 = arith.constant 0 : i32
    %c0_i32_2 = arith.constant 0 : i32
    return %c0_i32, %c0_i32_0, %c0_i32_1 : i32, i32, i32
  }
  func.func @transform_2(%arg0: i32, %arg1: i32) -> (i32, i32) {
    %c0_i32 = arith.constant 0 : i32
    %c0_i32_0 = arith.constant 0 : i32
    %c0_i32_1 = arith.constant 0 : i32
    return %c0_i32, %c0_i32_0 : i32, i32
  }
  func.func @transform_3(%arg0: i32, %arg1: i32) -> (i32, i32) {
    %c0_i32 = arith.constant 0 : i32
    %c0_i32_0 = arith.constant 0 : i32
    %c0_i32_1 = arith.constant 0 : i32
    return %c0_i32, %c0_i32_0 : i32, i32
  }
  func.func @transform_4(%arg0: i32, %arg1: i32) -> (i32, i32, i32, i32) {
    %c0_i32 = arith.constant 0 : i32
    %c0_i32_0 = arith.constant 0 : i32
    %c0_i32_1 = arith.constant 0 : i32
    return %arg0, %arg1, %c0_i32, %c0_i32_0 : i32, i32, i32, i32
  }
}

</mosaic_0001>

<bundles_post_ra>
// kernel: conv2d_block.1
= control target key start
LH: loop header
LB: loop body
LE: loop exit
PB: predicated region body
PF: predicated region fallthrough
CT: control target
= control target key end

     0   :  { %s5327_s15 = smov 0   ;;  %s5329_s16 = smov 0   ;;  %s7387_s0 = inlined_call_operand.vmem [shape: bf16[2,2,9,16,16], index: 0, kind: input, shape index: {}]   ;;  %s7388_s1 = inlined_call_operand.vmem [shape: bf16[9,16,128], index: 1, kind: input, shape index: {}]   ;;  %s7389_s2 = inlined_call_operand.vmem [shape: f32[1,128], index: 2, kind: input, shape index: {}]   ;;  %s7390_s3 = inlined_call_operand.vmem [shape: f32[1,128], index: 3, kind: input, shape index: {}]   ;;  %s7391_s4 = inlined_call_operand.vmem [shape: bf16[2,2,98,128], index: 4, kind: output, shape index: {}]  }
   0x1   :  { %s5331_s17 = smov 0   ;;  %s5333_s18 = smov 0  }
   0x2   :  { %s5335_s19 = smov 0  }
   0x3 LB: > { %s23_s20 = sadd.s32 1, %s5289_s17  ;;  %s26_s21 = sadd.s32 1, %s5293_s18  ;;  %s5297_s19 = sphi %s5335_s19, %s14_s19   ;;  %s5293_s18 = sphi %s5333_s18, %s7711_s18   ;;  %s5289_s17 = sphi %s5331_s17, %s7710_s17   ;;  %s5285_s16 = sphi %s5329_s16, %s7709_s16   ;;  %s5281_s15 = sphi %s5327_s15, %s7708_s15  }
   0x4   : > { %p24_p0 = scmp.ge.s32.totalorder %s23_s20, 2  ;;  %p4606_p1 = scmp.ge.s32.totalorder %s5297_s19, 1 }
   0x5   : > { %p182_p2 = scmp.lt.s32.totalorder %s5297_s19, 5 }
   0x6   : > { %s7713_s20 = smov (%p24_p0, %s23_s20), 0  ;;  %s7715_s21 = smov (!%p24_p0, %s26_s21), %s5293_s18 }
   0x7   : > { %p183_p3 = pnand %p4606_p1, %p182_p2  ;;  %p28_p4 = scmp.ge.s32.totalorder %s7715_s21, 2 }
   0x9   : > { %s7717_s21 = smov (%p28_p4, %s7715_s21), 0  ;;  %186 = sbr.rel (%p183_p3) target bundleno = 541 (0x21d), region = 36 }
   0xe   : > { %v5250_v0 = vld [vmem:[%s7388_s1 + $0x8] sm:$0xff]   ;;  %v278_v1 = vlaneseq  ;;  %v7392_v2 = vmov 0.0   ;;  %p216_p5 = scmp.lt.s32.totalorder %s5285_s16, 1  ;;  %p218_p6 = scmp.lt.s32.totalorder %s5281_s15, 1  ;;  %v5300_v3 = vmov 1966171168  }
   0xf   : > { %4931 = vmatprep.subr.bf16.mxu0 %v7392_v2  ;;  %5201 = vmatprep.subr.bf16.mxu1 %v7392_v2  ;;  %v276_v4 = vunpack.c.l.s4 %v5300_v3  ;;  %vm605_vm0 = vsmask.f32 256  ;;  %vm606_vm1 = vsmask.f32 1284  ;;  %vm5301_vm2 = vmmov 0  }
  0x10   : > { %4932 = vmatpush3.bf16.msra.mxu0 %v5250_v0  ;;  %5202 = vmatpush3.bf16.msra.mxu1 %v5250_v0  ;;  %s7719_s16 = smov (!%p216_p5, %s5285_s16), 1  ;;  %vm607_vm3 = vmor %vm605_vm0, %vm606_vm1  ;;  %vm608_vm4 = vsmask.f32 2312  ;;  %vm610_vm5 = vsmask.f32 3340  ;;  %s7721_s15 = smov (!%p218_p6, %s5281_s15), 1 }
  0x11   : > { %4933 = vmatprep.mubr.msk.bf16.mxu0 %vm5301_vm2, %v7392_v2  ;;  %4949 = vmatprep.mubr.msk.bf16.mxu1 %vm5301_vm2, %v7392_v2  ;;  %v277_v5 = vunpack.c.0.s8 %v276_v4  ;;  %v279_v6 = vshrl.u32 %v278_v1, 7  ;;  %vm609_vm6 = vmor %vm607_vm3, %vm608_vm4  ;;  %vm612_vm7 = vsmask.f32 4368  ;;  %s5204_s24 = smul.u32 36, %s7719_s16  ;;  %vm614_vm9 = vsmask.f32 5396 }
  0x12   : > { %4991 = vmatprep.subr.bf16.mxu0 %v7392_v2  ;;  %4961 = vmatprep.subr.bf16.mxu1 %v7392_v2  ;;  %vm611_vm8 = vmor %vm609_vm6, %vm610_vm5  ;;  %s5203_s25 = smul.u32 18, %s7721_s15  ;;  %vm616_vm11 = vsmask.f32 6424  ;;  %vm618_vm12 = vsmask.f32 7452  ;;  %v7501_v21 = vmov 0 }
  0x13   : > { %vm613_vm10 = vmor %vm611_vm8, %vm612_vm7  ;;  %v5384_v7 = vsub.s32 %v277_v5, %v279_v6  ;;  %vm1336_vm0 = vcmask 130048   ;;  %s5205_s28 = smul.u32 13, %s7721_s15 }
  0x14   : > { %s222_s26 = sadd.s32 %s5204_s24, %s5203_s25  ;;  %vm615_vm13 = vmor %vm613_vm10, %vm614_vm9  ;;  %s5206_s29 = smul.u32 26, %s7719_s16 }
  0x15   : > { %s4607_s27 = sshll.u32 %s222_s26, 2  ;;  %vm617_vm14 = vmor %vm615_vm13, %vm616_vm11 }
  0x16   : > { %s5389_s30 = scalar_lea.vmem %s7387_s0, %s4607_s27  ;;  %vm5418_vm15 = vmor %vm617_vm14, %vm618_vm12  ;;  %s231_s6 = sadd.s32 %s5206_s29, %s5205_s28 }
  0x17   : > { %v4609_v8 = vld.sshfl [vmem:[%s5389_s30] sm:$0x33 pattern:$0x75316420]  ;;  %v7502_v21 = vsel %vm5418_vm15, 4294967295, %v7501_v21  ;;  %s4608_s7 = sshll.u32 %s231_s6, 2 }
  0x18   : > { %v4610_v9 = vld.sshfl [vmem:[%s5389_s30 + $0x4] sm:$0x33 pattern:$0x75316420]  ;;  %v274_v10 = vcombine.high %v4609_v8, %v4609_v8  ;;  %v5394_v11 = vrot.slane %v4609_v8, %v5384_v7  ;;  %7503 = vst [vmem:[#allocation2_spill] sm:$0xff] %v7502_v21  ;;  %s7316_s10 = scalar_lea.vmem %s7391_s4, %s4608_s7 }
  0x19   : > { %v4611_v12 = vld.sshfl [vmem:[%s5389_s30 + $0x8] sm:$0x33 pattern:$0x75316420]  ;;  %v298_v13 = vcombine.high %v4610_v9, %v4610_v9  ;;  %v5398_v14 = vrot.slane %v4610_v9, %v5384_v7 }
  0x1a   : > { %v5401_v15 = vrot.slane %v274_v10, %v5384_v7  ;;  %v5405_v16 = vcombine.high %v5394_v11, %v5394_v11  ;;  %v321_v17 = vcombine.high %v4611_v12, %v4611_v12  ;;  %v5408_v18 = vrot.slane %v4611_v12, %v5384_v7  ;;  %v4618_v44 = vld.sshfl [vmem:[%s5389_s30 + $0x24] sm:$0x33 pattern:$0x75316420] }
  0x1b   : > { %v5411_v19 = vrot.slane %v298_v13, %v5384_v7  ;;  %v5415_v20 = vcombine.high %v5398_v14, %v5398_v14  ;;  %v621_v22 = vshrl.u32 %v5394_v11, 16  ;;  %v650_v23 = vshll.u32 %v5398_v14, 16  ;;  %v4619_v49 = vld.sshfl [vmem:[%s5389_s30 + $0x28] sm:$0x33 pattern:$0x75316420] }
  0x1c   : > { %v5426_v24 = vcombine.high %v5401_v15, %v5401_v15  ;;  %v5429_v25 = vrot.slane %v321_v17, %v5384_v7  ;;  %v626_v26 = vshll.u32 %v5401_v15, 16  ;;  %v629_v27 = vshrl.u32 %v5401_v15, 16  ;;  %v4620_v53 = vld.sshfl [vmem:[%s5389_s30 + $0x2c] sm:$0x33 pattern:$0x75316420] }
  0x1d   : > { %v5435_v28 = vcombine.high %v5411_v19, %v5411_v19  ;;  %v634_v29 = vshll.u32 %v5405_v16, 16  ;;  %v637_v30 = vshrl.u32 %v5405_v16, 16  ;;  %v653_v31 = vshrl.u32 %v5398_v14, 16 }
  0x1e   : > { %v628_v32 = vsel %vm5418_vm15, %v621_v22, %v626_v26  ;;  %v642_v33 = vshll.u32 %v5426_v24, 16  ;;  %v645_v34 = vshrl.u32 %v5426_v24, 16  ;;  %v658_v35 = vshll.u32 %v5411_v19, 16 }
  0x1f   : > { %v636_v36 = vsel %vm5418_vm15, %v629_v27, %v634_v29  ;;  %v661_v37 = vshrl.u32 %v5411_v19, 16  ;;  %v666_v38 = vshll.u32 %v5415_v20, 16  ;;  %v669_v39 = vshrl.u32 %v5415_v20, 16 }
  0x20   : > { %v644_v40 = vsel %vm5418_vm15, %v637_v30, %v642_v33  ;;  %v652_v41 = vsel %vm5418_vm15, %v645_v34, %v650_v23  ;;  %v660_v42 = vsel %vm5418_vm15, %v653_v31, %v658_v35  ;;  %v674_v43 = vshll.u32 %v5435_v28, 16 }
  0x21   : > { %v668_v45 = vsel %vm5418_vm15, %v661_v37, %v666_v38  ;;  %v678_v46 = vshrl.u32 %v5408_v18, 16  ;;  %v683_v47 = vshll.u32 %v5429_v25, 16  ;;  %v1022_v48 = vcombine.low %v628_v32, %v636_v36 }
  0x22   : > { %v676_v50 = vsel %vm5418_vm15, %v669_v39, %v674_v43  ;;  %v1023_v51 = vcombine.low %v644_v40, %v652_v41  ;;  %v1024_v52 = vcombine.low %v660_v42, %v668_v45  ;;  %v486_v56 = vcombine.high %v4618_v44, %v4618_v44  ;;  %v5251_v39 = vld [vmem:[%s7388_s1 + $0x10] sm:$0xff]  }
  0x23   : > { %v5468_v54 = vsel %vm5418_vm15, %v678_v46, %v683_v47  ;;  %v1032_v55 = vrot.slane %v1022_v48, %v5384_v7  ;;  %v5472_v57 = vrot.slane %v4618_v44, %v5384_v7  ;;  %v509_v61 = vcombine.high %v4619_v49, %v4619_v49 }
  0x24   : > { %v1025_v58 = vcombine.low %v676_v50, %v5468_v54  ;;  %v1039_v59 = vrot.slane %v1023_v51, %v5384_v7  ;;  %v1046_v60 = vrot.slane %v1024_v52, %v5384_v7  ;;  %v5478_v62 = vrot.slane %v486_v56, %v5384_v7  ;;  %v4612_v52 = vld.sshfl [vmem:[%s5389_s30 + $0xc] sm:$0x33 pattern:$0x75316420] }
  0x25   : > { %v5482_v63 = vcombine.high %v5472_v57, %v5472_v57  ;;  %v5485_v0 = vrot.slane %v4619_v49, %v5384_v7  ;;  %v533_v1 = vcombine.high %v4620_v53, %v4620_v53  ;;  %v5489_v5 = vrot.slane %v509_v61, %v5384_v7  ;;  %v4613_v56 = vld.sshfl [vmem:[%s5389_s30 + $0x10] sm:$0x33 pattern:$0x75316420] }
  0x26   : > { %v1053_v3 = vrot.slane %v1025_v58, %v5384_v7  ;;  %v1054_v4 = vcombine.low %v1032_v55, %v1039_v59  ;;  %v5492_v6 = vrot.slane %v4620_v53, %v5384_v7  ;;  %v5503_v10 = vcombine.high %v5478_v62, %v5478_v62 }
  0x27   : > { %7504 = vst [vmem:[#allocation3_spill] sm:$0xff] %v5489_v5  ;;  %v5496_v8 = vcombine.high %v5485_v0, %v5485_v0  ;;  %v5499_v9 = vrot.slane %v533_v1, %v5384_v7  ;;  %v881_v12 = vshrl.u32 %v5472_v57, 16  ;;  %v5509_v22 = vcombine.high %v5489_v5, %v5489_v5 }
  0x28   : > { %7505 = vst [vmem:[#allocation4_spill] sm:$0xff] %v5492_v6  ;;  %7507 = vst [vmem:[#allocation6_spill] sm:$0xff] %v5503_v10  ;;  %v1055_v13 = vcombine.low %v1046_v60, %v1053_v3  ;;  %v1062_v17 = vrot.slane %v1054_v4, %v5384_v7  ;;  %v886_v23 = vshll.u32 %v5478_v62, 16  ;;  %v889_v26 = vshrl.u32 %v5478_v62, 16 }
  0x29   : > { %7506 = vst [vmem:[#allocation5_spill] sm:$0xff] %v5499_v9  ;;  %7508 = vst [vmem:[#allocation7_spill] sm:$0xff] %v5509_v22  ;;  %v894_v27 = vshll.u32 %v5482_v63, 16  ;;  %v897_v29 = vshrl.u32 %v5482_v63, 16  ;;  %v902_v30 = vshll.u32 %v5503_v10, 16  ;;  %v906_v33 = vshrl.u32 %v5485_v0, 16 }
  0x2a   : > { %v1069_v31 = vrot.slane %v1055_v13, %v5384_v7  ;;  %v5519_v32 = vsel %vm5418_vm15, %v881_v12, %v886_v23  ;;  %v911_v34 = vshll.u32 %v5489_v5, 16  ;;  %v914_v37 = vshrl.u32 %v5489_v5, 16 }
  0x2b   : > { %7509 = vst [vmem:[#allocation8_spill] sm:$0xff] %v5519_v32  ;;  %v5525_v35 = vsel %vm5418_vm15, %v889_v26, %v894_v27  ;;  %v5529_v36 = vsel %vm5418_vm15, %v897_v29, %v902_v30  ;;  %v919_v38 = vshll.u32 %v5496_v8, 16  ;;  %v922_v42 = vshrl.u32 %v5496_v8, 16 }
  0x2c   : > { %7510 = vst [vmem:[#allocation9_spill] sm:$0xff] %v5525_v35  ;;  %7511 = vst [vmem:[#allocation10_spill] sm:$0xff] %v5529_v36  ;;  %v1070_v40 = vcombine.low %v1062_v17, %v1069_v31  ;;  %v5538_v41 = vsel %vm5418_vm15, %v906_v33, %v911_v34  ;;  %v927_v43 = vshll.u32 %v5509_v22, 16  ;;  %v930_v45 = vshrl.u32 %v5509_v22, 16 }
  0x2d   : > { %7512 = vst [vmem:[#allocation11_spill] sm:$0xff] %v5538_v41  ;;  %v5544_v44 = vsel %vm5418_vm15, %v914_v37, %v919_v38  ;;  %v935_v46 = vshll.u32 %v5492_v6, 16  ;;  %v938_v47 = vshrl.u32 %v5492_v6, 16  ;;  %v943_v49 = vshll.u32 %v5499_v9, 16 }
  0x2e   : > { %7513 = vst [vmem:[#allocation12_spill] sm:$0xff] %v5544_v44  ;;  %4934 = vmatmul.mubr.msk.bf16.vlgmr.msra.gmra.mxu0 %vm1336_vm0, %v1070_v40  ;;  %v5552_v48 = vsel %vm5418_vm15, %v922_v42, %v927_v43  ;;  %v1218_v50 = vcombine.low %v5519_v32, %v5525_v35  ;;  %v1219_v51 = vcombine.low %v5529_v36, %v5538_v41  ;;  %v686_v59 = vshrl.u32 %v5429_v25, 16 }
  0x2f   : > { %7514 = vst [vmem:[#allocation13_spill] sm:$0xff] %v5552_v48  ;;  %v5562_v53 = vsel %vm5418_vm15, %v930_v45, %v935_v46  ;;  %v1220_v55 = vcombine.low %v5544_v44, %v5552_v48  ;;  %4992 = vmatpush3.bf16.msra.mxu0 %v5251_v39  ;;  %4937 = vmatprep.mubr.msk.bf16.mxu0 %vm5301_vm2, %v7392_v2 }
  0x30   : > { %7515 = vst [vmem:[#allocation14_spill] sm:$0xff] %v5562_v53  ;;  %v5571_v58 = vcombine.high %v5408_v18, %v5408_v18  ;;  %v5576_v60 = vsel %vm5418_vm15, %v938_v47, %v943_v49  ;;  %v5579_v61 = vrot.slane %v1218_v50, %v5384_v7  ;;  %v5582_v1 = vrot.slane %v1219_v51, %v5384_v7 }
  0x31   : > { %7516 = vst [vmem:[#allocation15_spill] sm:$0xff] %v5576_v60  ;;  %v5586_v3 = vcombine.high %v5429_v25, %v5429_v25  ;;  %5051 = vmatprep.subr.bf16.mxu0 %v7392_v2  ;;  %v1221_v4 = vcombine.low %v5562_v53, %v5576_v60  ;;  %v5592_v12 = vrot.slane %v1220_v55, %v5384_v7 }
  0x32   : > { %7517 = vst [vmem:[#allocation16_spill] sm:$0xff] %v5579_v61  ;;  %7518 = vst [vmem:[#allocation17_spill] sm:$0xff] %v5582_v1  ;;  %v345_v13 = vcombine.high %v4612_v52, %v4612_v52  ;;  %v5595_v17 = vrot.slane %v4612_v52, %v5384_v7  ;;  %v1250_v23 = vcombine.low %v5579_v61, %v5582_v1  ;;  %v691_v29 = vshll.u32 %v5571_v58, 16 }
  0x33   : > { %7519 = vst [vmem:[#allocation18_spill] sm:$0xff] %v5592_v12  ;;  %v368_v26 = vcombine.high %v4613_v56, %v4613_v56  ;;  %v5600_v27 = vrot.slane %v4613_v56, %v5384_v7  ;;  %v5604_v30 = vrot.slane %v1221_v4, %v5384_v7  ;;  %v694_v34 = vshrl.u32 %v5571_v58, 16  ;;  %v5252_v4 = vld [vmem:[%s7388_s1] sm:$0xff]  }
  0x34   : > { %v5607_v31 = vrot.slane %v345_v13, %v5384_v7  ;;  %v5611_v33 = vcombine.high %v5595_v17, %v5595_v17  ;;  %v1258_v37 = vrot.slane %v1250_v23, %v5384_v7  ;;  %v5624_v40 = vsel %vm5418_vm15, %v686_v59, %v691_v29  ;;  %v4622_v1 = vld.sshfl [vmem:[%s5389_s30 + $0x34] sm:$0x33 pattern:$0x75316420] }
  0x35   : > { %7520 = vst [vmem:[#allocation19_spill] sm:$0xff] %v5604_v30  ;;  %v5616_v38 = vrot.slane %v368_v26, %v5384_v7  ;;  %v5620_v39 = vcombine.high %v5600_v27, %v5600_v27  ;;  %v1251_v42 = vcombine.low %v5592_v12, %v5604_v30  ;;  %v699_v45 = vshll.u32 %v5586_v3, 16 }
  0x36   : > { %v5630_v43 = vcombine.high %v5607_v31, %v5607_v31  ;;  %v702_v46 = vshrl.u32 %v5586_v3, 16  ;;  %v707_v47 = vshll.u32 %v5595_v17, 16  ;;  %v710_v49 = vshrl.u32 %v5595_v17, 16 }
  0x37   : > { %v715_v50 = vshll.u32 %v5607_v31, 16  ;;  %v718_v51 = vshrl.u32 %v5607_v31, 16  ;;  %v1265_v52 = vrot.slane %v1251_v42, %v5384_v7  ;;  %v5641_v55 = vsel %vm5418_vm15, %v694_v34, %v699_v45 }
  0x38   : > { %v723_v56 = vshll.u32 %v5611_v33, 16  ;;  %v726_v59 = vshrl.u32 %v5611_v33, 16  ;;  %v5650_v13 = vsel %vm5418_vm15, %v702_v46, %v707_v47  ;;  %v731_v26 = vshll.u32 %v5630_v43, 16 }
  0x39   : > { %v5654_v23 = vsel %vm5418_vm15, %v710_v49, %v715_v50  ;;  %v735_v29 = vshrl.u32 %v5600_v27, 16  ;;  %v1266_v34 = vcombine.low %v1258_v37, %v1265_v52  ;;  %v740_v45 = vshll.u32 %v5616_v38, 16 }
  0x3a   : > { %7521 = vst [vmem:[#allocation20_spill] sm:$0xff] %v5654_v23  ;;  %v5660_v42 = vsel %vm5418_vm15, %v718_v51, %v723_v56  ;;  %v743_v2 = vshrl.u32 %v5616_v38, 16  ;;  %v5666_v46 = vsel %vm5418_vm15, %v726_v59, %v731_v26  ;;  %v748_v47 = vshll.u32 %v5620_v39, 16 }
  0x3b   : > { %7522 = vst [vmem:[#allocation21_spill] sm:$0xff] %v5660_v42  ;;  %7523 = vst [vmem:[#allocation22_spill] sm:$0xff] %v5666_v46  ;;  %v1071_v49 = vcombine.low %v5624_v40, %v5641_v55  ;;  %v1072_v37 = vcombine.low %v5650_v13, %v5654_v23  ;;  %4950 = vmatmul.mubr.msk.bf16.vlgmr.msra.gmra.mxu1 %vm1336_vm0, %v1266_v34  ;;  %v5676_v50 = vsel %vm5418_vm15, %v735_v29, %v740_v45  ;;  %v7525_v59 = vmov 0.0  }
  0x3c   : > { %7524 = vst [vmem:[#allocation23_spill] sm:$0xff] %v5676_v50  ;;  %v1073_v51 = vcombine.low %v5660_v42, %v5666_v46  ;;  %4962 = vmatpush3.bf16.msra.mxu1 %v5252_v4  ;;  %4953 = vmatprep.mubr.msk.bf16.mxu1 %vm5301_vm2, %v7525_v59  ;;  %v5688_v26 = vsel %vm5418_vm15, %v743_v2, %v748_v47  ;;  %v4621_v45 = vld.sshfl [vmem:[%s5389_s30 + $0x30] sm:$0x33 pattern:$0x75316420] }
  0x3d   : > { %7526 = vst [vmem:[#allocation24_spill] sm:$0xff] %v5688_v26  ;;  %v1081_v29 = vrot.slane %v1071_v49, %v5384_v7  ;;  %v1088_v34 = vrot.slane %v1072_v37, %v5384_v7  ;;  %v1074_v30 = vcombine.low %v5676_v50, %v5688_v26  ;;  %5021 = vmatprep.subr.bf16.mxu1 %v7525_v59 }
  0x3e   : > { %v1095_v52 = vrot.slane %v1073_v51, %v5384_v7  ;;  %v5704_v47 = vcombine.high %v5492_v6, %v5492_v6  ;;  %v556_v37 = vcombine.high %v4621_v45, %v4621_v45  ;;  %v946_v51 = vshrl.u32 %v5499_v9, 16 }
  0x3f   : > { %v1103_v2 = vcombine.low %v1081_v29, %v1088_v34  ;;  %v5707_v49 = vrot.slane %v1074_v30, %v5384_v7  ;;  %v5712_v4 = vrot.slane %v4621_v45, %v5384_v7  ;;  %v580_v56 = vcombine.high %v4622_v1, %v4622_v1 }
  0x40   : > { %7527 = vst [vmem:[#allocation25_spill] sm:$0xff] %v5704_v47  ;;  %v5715_v61 = vrot.slane %v4622_v1, %v5384_v7  ;;  %v5719_v34 = vrot.slane %v556_v37, %v5384_v7  ;;  %v5723_v30 = vcombine.high %v5499_v9, %v5499_v9  ;;  %v951_v60 = vshll.u32 %v5704_v47, 16 }
  0x41   : > { %7528 = vst [vmem:[#allocation26_spill] sm:$0xff] %v5707_v49  ;;  %v1111_v12 = vrot.slane %v1103_v2, %v5384_v7  ;;  %7529 = vst [vmem:[#allocation27_spill] sm:$0xff] %v5712_v4  ;;  %v1104_v29 = vcombine.low %v1095_v52, %v5707_v49  ;;  %v5728_v2 = vcombine.high %v5712_v4, %v5712_v4  ;;  %v954_v52 = vshrl.u32 %v5704_v47, 16 }
  0x42   : > { %7530 = vst [vmem:[#allocation28_spill] sm:$0xff] %v5715_v61  ;;  %7531 = vst [vmem:[#allocation29_spill] sm:$0xff] %v5719_v34  ;;  %v5731_v45 = vrot.slane %v580_v56, %v5384_v7  ;;  %v5735_v1 = vcombine.high %v5715_v61, %v5715_v61  ;;  %v5741_v48 = vcombine.high %v5719_v34, %v5719_v34  ;;  %v959_v56 = vshll.u32 %v5723_v30, 16 }
  0x43   : > { %7532 = vst [vmem:[#allocation30_spill] sm:$0xff] %v5723_v30  ;;  %7533 = vst [vmem:[#allocation31_spill] sm:$0xff] %v5728_v2  ;;  %v1118_v37 = vrot.slane %v1104_v29, %v5384_v7  ;;  %v5745_v53 = vsel %vm5418_vm15, %v946_v51, %v951_v60  ;;  %v963_v41 = vshrl.u32 %v5712_v4, 16  ;;  %v968_v44 = vshll.u32 %v5719_v34, 16 }
  0x44   : > { %7534 = vst [vmem:[#allocation32_spill] sm:$0xff] %v5731_v45  ;;  %7535 = vst [vmem:[#allocation33_spill] sm:$0xff] %v5735_v1  ;;  %v971_v35 = vshrl.u32 %v5719_v34, 16  ;;  %v976_v36 = vshll.u32 %v5728_v2, 16  ;;  %v5754_v32 = vsel %vm5418_vm15, %v954_v52, %v959_v56  ;;  %v979_v26 = vshrl.u32 %v5728_v2, 16 }
  0x45   : > { %7536 = vst [vmem:[#allocation34_spill] sm:$0xff] %v5741_v48  ;;  %7537 = vst [vmem:[#allocation35_spill] sm:$0xff] %v5745_v53  ;;  %v1119_v29 = vcombine.low %v1111_v12, %v1118_v37  ;;  %v984_v60 = vshll.u32 %v5741_v48, 16  ;;  %v5760_v51 = vsel %vm5418_vm15, %v963_v41, %v968_v44  ;;  %v987_v50 = vshrl.u32 %v5741_v48, 16 }
  0x46   : > { %7538 = vst [vmem:[#allocation36_spill] sm:$0xff] %v5754_v32  ;;  %7539 = vst [vmem:[#allocation37_spill] sm:$0xff] %v5760_v51  ;;  %v5764_v30 = vsel %vm5418_vm15, %v971_v35, %v976_v36  ;;  %v992_v12 = vshll.u32 %v5715_v61, 16  ;;  %v995_v56 = vshrl.u32 %v5715_v61, 16  ;;  %v1000_v41 = vshll.u32 %v5731_v45, 16 }
  0x47   : > { %7540 = vst [vmem:[#allocation38_spill] sm:$0xff] %v5764_v30  ;;  %v4614_v37 = vld.sshfl [vmem:[%s5389_s30 + $0x14] sm:$0x33 pattern:$0x75316420]  ;;  %4938 = vmatmul.mubr.msk.bf16.gmra.mxu0 %vm1336_vm0, %v1119_v29  ;;  %v5772_v52 = vsel %vm5418_vm15, %v979_v26, %v984_v60  ;;  %v1003_v44 = vshrl.u32 %v5731_v45, 16  ;;  %v1267_v48 = vcombine.low %v5745_v53, %v5754_v32  ;;  %v1268_v29 = vcombine.low %v5760_v51, %v5764_v30 }
  0x48   : > { %7541 = vst [vmem:[#allocation39_spill] sm:$0xff] %v5772_v52  ;;  %v5779_v35 = vsel %vm5418_vm15, %v987_v50, %v992_v12  ;;  %v1008_v36 = vshll.u32 %v5735_v1, 16  ;;  %4941 = vmatprep.mubr.msk.bf16.mxu0 %vm5301_vm2, %v7525_v59  ;;  %v4615_v26 = vld.sshfl [vmem:[%s5389_s30 + $0x18] sm:$0x33 pattern:$0x75316420]  ;;  %v5791_v60 = vsel %vm5418_vm15, %v995_v56, %v1000_v41  ;;  %v5797_v12 = vcombine.high %v5616_v38, %v5616_v38 }
  0x49   : > { %7542 = vst [vmem:[#allocation40_spill] sm:$0xff] %v5779_v35  ;;  %7543 = vst [vmem:[#allocation41_spill] sm:$0xff] %v5791_v60  ;;  %v1269_v50 = vcombine.low %v5772_v52, %v5779_v35  ;;  %v392_v2 = vcombine.high %v4614_v37, %v4614_v37  ;;  %v5804_v30 = vrot.slane %v1267_v48, %v5384_v7 }
  0x4a   : > { %v5801_v32 = vsel %vm5418_vm15, %v1003_v44, %v1008_v36  ;;  %v5807_v51 = vrot.slane %v1268_v29, %v5384_v7  ;;  %v5810_v56 = vrot.slane %v4614_v37, %v5384_v7  ;;  %v415_v44 = vcombine.high %v4615_v26, %v4615_v26 }
  0x4b   : > { %7544 = vst [vmem:[#allocation42_spill] sm:$0xff] %v5801_v32  ;;  %7545 = vst [vmem:[#allocation43_spill] sm:$0xff] %v5804_v30  ;;  %v1270_v41 = vcombine.low %v5791_v60, %v5801_v32  ;;  %v5815_v35 = vrot.slane %v1269_v50, %v5384_v7  ;;  %v5818_v52 = vrot.slane %v392_v2, %v5384_v7  ;;  %v751_v29 = vshrl.u32 %v5620_v39, 16 }
  0x4c   : > { %7546 = vst [vmem:[#allocation44_spill] sm:$0xff] %v5807_v51  ;;  %7547 = vst [vmem:[#allocation45_spill] sm:$0xff] %v5810_v56  ;;  %v1299_v48 = vcombine.low %v5804_v30, %v5807_v51  ;;  %v5824_v36 = vcombine.high %v5810_v56, %v5810_v56  ;;  %v5827_v37 = vrot.slane %v4615_v26, %v5384_v7  ;;  %v756_v51 = vshll.u32 %v5797_v12, 16 }
  0x4d   : > { %7548 = vst [vmem:[#allocation46_spill] sm:$0xff] %v5815_v35  ;;  %7549 = vst [vmem:[#allocation47_spill] sm:$0xff] %v5818_v52  ;;  %v5831_v60 = vrot.slane %v1270_v41, %v5384_v7  ;;  %v5834_v50 = vrot.slane %v415_v44, %v5384_v7  ;;  %v5838_v2 = vcombine.high %v5818_v52, %v5818_v52  ;;  %v759_v53 = vshrl.u32 %v5797_v12, 16 }
  0x4e   : > { %v1307_v30 = vrot.slane %v1299_v48, %v5384_v7  ;;  %v5844_v26 = vcombine.high %v5827_v37, %v5827_v37  ;;  %v764_v41 = vshll.u32 %v5810_v56, 16  ;;  %v5856_v10 = vsel %vm5418_vm15, %v751_v29, %v756_v51 }
  0x4f   : > { %7550 = vst [vmem:[#allocation48_spill] sm:$0xff] %v5831_v60  ;;  %v1300_v44 = vcombine.low %v5815_v35, %v5831_v60  ;;  %v5852_v46 = vcombine.high %v5834_v50, %v5834_v50  ;;  %7551 = vst [vmem:[#allocation49_spill] sm:$0xff] %v5856_v10  ;;  %v767_v48 = vshrl.u32 %v5810_v56, 16  ;;  %v772_v23 = vshll.u32 %v5818_v52, 16 }
  0x50   : > { %v5861_v42 = vsel %vm5418_vm15, %v759_v53, %v764_v41  ;;  %v775_v61 = vshrl.u32 %v5818_v52, 16  ;;  %v780_v35 = vshll.u32 %v5824_v36, 16  ;;  %v783_v4 = vshrl.u32 %v5824_v36, 16 }
  0x51   : > { %7552 = vst [vmem:[#allocation50_spill] sm:$0xff] %v5861_v42  ;;  %v1314_v60 = vrot.slane %v1300_v44, %v5384_v7  ;;  %v788_v34 = vshll.u32 %v5838_v2, 16  ;;  %v792_v51 = vshrl.u32 %v5827_v37, 16  ;;  %v5872_v29 = vsel %vm5418_vm15, %v767_v48, %v772_v23 }
  0x52   : > { %7553 = vst [vmem:[#allocation51_spill] sm:$0xff] %v5872_v29  ;;  %v5876_v53 = vsel %vm5418_vm15, %v775_v61, %v780_v35  ;;  %v797_v41 = vshll.u32 %v5834_v50, 16  ;;  %v800_v9 = vshrl.u32 %v5834_v50, 16  ;;  %v805_v22 = vshll.u32 %v5844_v26, 16 }
  0x53   : > { %7554 = vst [vmem:[#allocation52_spill] sm:$0xff] %v5876_v53  ;;  %v1315_v44 = vcombine.low %v1307_v30, %v1314_v60  ;;  %v5882_v47 = vsel %vm5418_vm15, %v783_v4, %v788_v34  ;;  %v808_v6 = vshrl.u32 %v5844_v26, 16  ;;  %v813_v61 = vshll.u32 %v5852_v46, 16 }
  0x54   : > { %7555 = vst [vmem:[#allocation53_spill] sm:$0xff] %v5882_v47  ;;  %v5888_v23 = vsel %vm5418_vm15, %v792_v51, %v797_v41  ;;  %v1120_v35 = vcombine.low %v5856_v10, %v5861_v42  ;;  %v1121_v30 = vcombine.low %v5872_v29, %v5876_v53  ;;  %v5898_v4 = vsel %vm5418_vm15, %v800_v9, %v805_v22  ;;  %v4616_v51 = vld.sshfl [vmem:[%s5389_s30 + $0x1c] sm:$0x33 pattern:$0x75316420] }
  0x55   : > { %7556 = vst [vmem:[#allocation54_spill] sm:$0xff] %v5888_v23  ;;  %4954 = vmatmul.mubr.msk.bf16.gmra.mxu1 %vm1336_vm0, %v1315_v44  ;;  %7557 = vst [vmem:[#allocation55_spill] sm:$0xff] %v5898_v4  ;;  %v1122_v34 = vcombine.low %v5882_v47, %v5888_v23  ;;  %v5904_v60 = vcombine.high %v5731_v45, %v5731_v45  ;;  %v1011_v48 = vshrl.u32 %v5735_v1, 16 }
  0x56   : > { %4957 = vmatprep.mubr.msk.bf16.mxu1 %vm5301_vm2, %v7525_v59  ;;  %v5912_v41 = vsel %vm5418_vm15, %v808_v6, %v813_v61  ;;  %v5915_v9 = vrot.slane %v1120_v35, %v5384_v7  ;;  %v5918_v22 = vrot.slane %v1121_v30, %v5384_v7  ;;  %v439_v61 = vcombine.high %v4616_v51, %v4616_v51 }
  0x57   : > { %7558 = vst [vmem:[#allocation56_spill] sm:$0xff] %v5904_v60  ;;  %7559 = vst [vmem:[#allocation57_spill] sm:$0xff] %v5912_v41  ;;  %v1123_v44 = vcombine.low %v5898_v4, %v5912_v41  ;;  %v5923_v23 = vrot.slane %v1122_v34, %v5384_v7  ;;  %v1016_v53 = vshll.u32 %v5904_v60, 16 }
  0x58   : > { %7560 = vst [vmem:[#allocation58_spill] sm:$0xff] %v5915_v9  ;;  %7561 = vst [vmem:[#allocation59_spill] sm:$0xff] %v5918_v22  ;;  %v1152_v47 = vcombine.low %v5915_v9, %v5918_v22  ;;  %v4617_v34 = vld.sshfl [vmem:[%s5389_s30 + $0x20] sm:$0x33 pattern:$0x75316420]  ;;  %v5948_v9 = vrot.slane %v4616_v51, %v5384_v7 }
  0x59   : > { %7562 = vst [vmem:[#allocation60_spill] sm:$0xff] %v5923_v23  ;;  %v5931_v35 = vrot.slane %v1123_v44, %v5384_v7  ;;  %v5937_v4 = vsel %vm5418_vm15, %v1011_v48, %v1016_v53  ;;  %v5952_v53 = vrot.slane %v439_v61, %v5384_v7  ;;  %v462_v48 = vcombine.high %v4617_v34, %v4617_v34 }
  0x5a   : > { %7564 = vst [vmem:[#allocation62_spill] sm:$0xff] %v5937_v4  ;;  %v1322_v42 = vrot.slane %v5937_v4, %v5384_v7  ;;  %v1160_v6 = vrot.slane %v1152_v47, %v5384_v7  ;;  %v5957_v49 = vcombine.high %v5948_v9, %v5948_v9  ;;  %v5960_v47 = vrot.slane %v4617_v34, %v5384_v7 }
  0x5b   : > { %7563 = vst [vmem:[#allocation61_spill] sm:$0xff] %v5931_v35  ;;  %v1153_v29 = vcombine.low %v5923_v23, %v5931_v35  ;;  %v5964_v51 = vrot.slane %v462_v48, %v5384_v7  ;;  %v816_v61 = vshrl.u32 %v5852_v46, 16  ;;  %v824_v34 = vshrl.u32 %v5948_v9, 16 }
  0x5c   : > { %v1329_v30 = vrot.slane %v1322_v42, %v5384_v7  ;;  %v5968_v42 = vcombine.high %v5952_v53, %v5952_v53  ;;  %v829_v44 = vshll.u32 %v5952_v53, 16  ;;  %v840_v4 = vshrl.u32 %v5957_v49, 16 }
  0x5d   : > { %v1167_v22 = vrot.slane %v1153_v29, %v5384_v7  ;;  %7565 = vst [vmem:[#allocation63_spill] sm:$0xff] %v5964_v51  ;;  %v821_v29 = vshll.u32 %v5948_v9, 16  ;;  %v5983_v48 = vcombine.high %v5964_v51, %v5964_v51  ;;  %v849_v10 = vshrl.u32 %v5960_v47, 16 }
  0x5e   : > { %4958 = vmatmul.mubr.msk.bf16.gmra.mxu1 %vm1336_vm0, %v1329_v30  ;;  %7566 = vst [vmem:[#allocation64_spill] sm:$0xff] %v5968_v42  ;;  %v5978_v30 = vcombine.high %v5960_v47, %v5960_v47  ;;  %v845_v32 = vshll.u32 %v5968_v42, 16  ;;  %v857_v60 = vshrl.u32 %v5964_v51, 16 }
  0x5f   : > { %v1168_v35 = vcombine.low %v1160_v6, %v1167_v22  ;;  %4963 = vmatprep.mubr.msk.bf16.mxu1 %vm5301_vm2, %v7525_v59  ;;  %v5987_v23 = vsel %vm5418_vm15, %v816_v61, %v821_v29  ;;  %v832_v22 = vshrl.u32 %v5952_v53, 16  ;;  %v837_v6 = vshll.u32 %v5957_v49, 16 }
  0x60   : > { %v6000_v61 = vsel %vm5418_vm15, %v824_v34, %v829_v44  ;;  %v854_v29 = vshll.u32 %v5964_v51, 16  ;;  %v6011_v42 = vsel %vm5418_vm15, %v840_v4, %v845_v32  ;;  %v865_v1 = vshrl.u32 %v5978_v30, 16 }
  0x61   : > { %4942 = vmatmul.mubr.msk.bf16.gmra.mxu0 %vm1336_vm0, %v1168_v35  ;;  %7567 = vst [vmem:[#allocation65_spill] sm:$0xff] %v6000_v61  ;;  %v862_v35 = vshll.u32 %v5978_v30, 16  ;;  %v6007_v41 = vsel %vm5418_vm15, %v832_v22, %v837_v6  ;;  %7569 = vst [vmem:[#allocation67_spill] sm:$0xff] %v6011_v42  ;;  %v870_v45 = vshll.u32 %v5983_v48, 16  ;;  %v873_v5 = vshrl.u32 %v5983_v48, 16 }
  0x62   : > { %4945 = vmatprep.mubr.msk.bf16.mxu0 %vm5301_vm2, %v7525_v59  ;;  %7568 = vst [vmem:[#allocation66_spill] sm:$0xff] %v6007_v41  ;;  %v6017_v44 = vsel %vm5418_vm15, %v849_v10, %v854_v29  ;;  %v878_v22 = vshll.u32 %v5472_v57, 16  ;;  %v1169_v4 = vcombine.low %v5987_v23, %v6000_v61  ;;  %v1170_v6 = vcombine.low %v6007_v41, %v6011_v42 }
  0x63   : > { %7570 = vst [vmem:[#allocation68_spill] sm:$0xff] %v6017_v44  ;;  %v6021_v34 = vsel %vm5418_vm15, %v857_v60, %v862_v35  ;;  %v6027_v32 = vsel %vm5418_vm15, %v865_v1, %v870_v45  ;;  %v1446_v29 = vcombine.low %v5394_v11, %v5401_v15  ;;  %v4682_v45 = vcombine.high %v5394_v11, %v5401_v15 }
  0x64   : > { %7571 = vst [vmem:[#allocation69_spill] sm:$0xff] %v6021_v34  ;;  %7572 = vst [vmem:[#allocation70_spill] sm:$0xff] %v6027_v32  ;;  %v1171_v10 = vcombine.low %v6017_v44, %v6021_v34  ;;  %v6037_v60 = vsel %vm5418_vm15, %v873_v5, %v878_v22  ;;  %v1448_v1 = vcombine.low %v5398_v14, %v5411_v19 }
  0x65   : > { %7573 = vst [vmem:[#allocation71_spill] sm:$0xff] %v6037_v60  ;;  %v1172_v35 = vcombine.low %v6027_v32, %v6037_v60  ;;  %v6048_v42 = vrot.slane %v1169_v4, %v5384_v7  ;;  %v6051_v34 = vrot.slane %v1170_v6, %v5384_v7  ;;  %v1449_v22 = vcombine.low %v5415_v20, %v5408_v18 }
  0x66   : > { %v6054_v5 = vrot.slane %v1171_v10, %v5384_v7  ;;  %v1456_v11 = vrot.slane %v1446_v29, %v5384_v7  ;;  %v1463_v21 = vrot.slane %v4682_v45, %v5384_v7  ;;  %v1470_v44 = vrot.slane %v1448_v1, %v5384_v7 }
  0x67   : > { %7574 = vst [vmem:[#allocation72_spill] sm:$0xff] %v6048_v42  ;;  %7575 = vst [vmem:[#allocation73_spill] sm:$0xff] %v6051_v34  ;;  %v6062_v60 = vrot.slane %v1172_v35, %v5384_v7  ;;  %v1201_v4 = vcombine.low %v6048_v42, %v6051_v34  ;;  %v1495_v6 = vcombine.low %v5429_v25, %v5571_v58 }
  0x68   : > { %7576 = vst [vmem:[#allocation74_spill] sm:$0xff] %v6054_v5  ;;  %v1496_v10 = vcombine.low %v5586_v3, %v5595_v17  ;;  %v1477_v32 = vrot.slane %v1449_v22, %v5384_v7  ;;  %v1478_v61 = vcombine.low %v1456_v11, %v1463_v21  ;;  %v1497_v29 = vcombine.low %v5607_v31, %v5611_v33 }
  0x69   : > { %7577 = vst [vmem:[#allocation75_spill] sm:$0xff] %v6062_v60  ;;  %v1498_v45 = vcombine.low %v5600_v27, %v5616_v38  ;;  %v1202_v1 = vcombine.low %v6054_v5, %v6062_v60  ;;  %v1209_v35 = vrot.slane %v1201_v4, %v5384_v7  ;;  %v1505_v34 = vrot.slane %v1495_v6, %v5384_v7 }
  0x6a   : > { %v1512_v58 = vrot.slane %v1496_v10, %v5384_v7  ;;  %v1479_v42 = vcombine.low %v1470_v44, %v1477_v32  ;;  %v1486_v3 = vrot.slane %v1478_v61, %v5384_v7  ;;  %v1519_v21 = vrot.slane %v1497_v29, %v5384_v7 }
  0x6b   : > { %v6083_v22 = vrot.slane %v1498_v45, %v5384_v7  ;;  %v1216_v11 = vrot.slane %v1202_v1, %v5384_v7  ;;  %v3176_v60 = vcombine.low %v5630_v43, %v5616_v38  ;;  %v1872_v4 = vcombine.low %v5401_v15, %v5405_v16 }
  0x6c   : > { %v1527_v41 = vcombine.low %v1505_v34, %v1512_v58  ;;  %v1493_v6 = vrot.slane %v1479_v42, %v5384_v7  ;;  %v1873_v61 = vcombine.low %v5426_v24, %v5398_v14  ;;  %v1874_v32 = vcombine.low %v5411_v19, %v5415_v20  ;;  %v5253_v34 = vld [vmem:[%s7388_s1 + $0x18] sm:$0xff]  }
  0x6d   : > { %v1528_v44 = vcombine.low %v1519_v21, %v6083_v22  ;;  %v1217_v10 = vcombine.low %v1209_v35, %v1216_v11  ;;  %v3183_v15 = vrot.slane %v3176_v60, %v5384_v7  ;;  %v1882_v16 = vrot.slane %v1872_v4, %v5384_v7 }
  0x6e   : > { %v6100_v43 = vrot.slane %v1527_v41, %v5384_v7  ;;  %v1494_v42 = vcombine.low %v1486_v3, %v1493_v6  ;;  %v1889_v14 = vrot.slane %v1873_v61, %v5384_v7  ;;  %v1896_v24 = vrot.slane %v1874_v32, %v5384_v7 }
  0x6f   : > { %v1542_v29 = vrot.slane %v1528_v44, %v5384_v7  ;;  %4946 = vmatmul.mubr.msk.bf16.gmra.mxu0 %vm1336_vm0, %v1217_v10  ;;  %v3184_v19 = vcombine.low %v1519_v21, %v3183_v15  ;;  %v7579_v20 = vcombine.low %v5435_v28, %v5429_v25  ;;  %v4683_v60 = vcombine.high %v5600_v27, %v5616_v38 }
  0x70   : > { %7578 = vst [vmem:[#allocation76_spill] sm:$0xff] %v6100_v43  ;;  %v1545_v45 = vcombine.low %v5810_v56, %v5818_v52  ;;  %4964 = vmatmul.mubr.msk.bf16.vlgmr.msra.gmra.mxu1 %vm1336_vm0, %v1494_v42  ;;  %4993 = vmatprep.mubr.msk.bf16.mxu0 %vm5301_vm2, %v7525_v59  ;;  %v1904_v35 = vcombine.low %v1882_v16, %v1889_v14 }
  0x71   : > { %v1903_v41 = vrot.slane %v7579_v20, %v5384_v7  ;;  %v1543_v1 = vcombine.low %v6100_v43, %v1542_v29  ;;  %v1546_v58 = vcombine.low %v5824_v36, %v5827_v37  ;;  %5022 = vmatpush3.bf16.msra.mxu1 %v5253_v34  ;;  %4967 = vmatprep.mubr.msk.bf16.mxu1 %vm5301_vm2, %v7525_v59  ;;  %v5254_v34 = vld [vmem:[%s7388_s1 + $0x20] sm:$0xff]  }
  0x72   : > { %v6125_v28 = vrot.slane %v3184_v19, %v5384_v7  ;;  %v1547_v21 = vcombine.low %v5834_v50, %v5844_v26  ;;  %v1912_v11 = vrot.slane %v1904_v35, %v5384_v7  ;;  %v6131_v4 = vrot.slane %v4683_v60, %v5384_v7  ;;  %5081 = vmatprep.subr.bf16.mxu1 %v7525_v59 }
  0x73   : > { %v1905_v3 = vcombine.low %v1896_v24, %v1903_v41  ;;  %v6134_v6 = vrot.slane %v1545_v45, %v5384_v7  ;;  %v6137_v44 = vrot.slane %v1546_v58, %v5384_v7  ;;  %v4696_v10 = vcombine.high %v5408_v18, %v5429_v25 }
  0x74   : > { %7580 = vst [vmem:[#allocation77_spill] sm:$0xff] %v6125_v28  ;;  %v6144_v26 = vrot.slane %v1547_v21, %v5384_v7  ;;  %v1922_v29 = vcombine.low %v5595_v17, %v5607_v31  ;;  %v4697_v19 = vcombine.high %v5595_v17, %v5607_v31  ;;  %v1924_v20 = vcombine.low %v5616_v38, %v5620_v39 }
  0x75   : > { %v1919_v32 = vrot.slane %v1905_v3, %v5384_v7  ;;  %v1576_v15 = vcombine.low %v6131_v4, %v6134_v6  ;;  %v6166_v41 = vrot.slane %v4696_v10, %v5384_v7  ;;  %v1593_v38 = vcombine.low %v5852_v46, %v5948_v9 }
  0x76   : > { %7581 = vst [vmem:[#allocation78_spill] sm:$0xff] %v6144_v26  ;;  %v1577_v24 = vcombine.low %v6137_v44, %v6144_v26  ;;  %v6170_v60 = vrot.slane %v1922_v29, %v5384_v7  ;;  %v1945_v45 = vrot.slane %v4697_v19, %v5384_v7  ;;  %v6174_v35 = vrot.slane %v1924_v20, %v5384_v7 }
  0x77   : > { %v1920_v14 = vcombine.low %v1912_v11, %v1919_v32  ;;  %v6178_v17 = vrot.slane %v1576_v15, %v5384_v7  ;;  %v1594_v58 = vcombine.low %v5952_v53, %v5957_v49  ;;  %v1595_v3 = vcombine.low %v5960_v47, %v5964_v51 }
  0x78   : > { %4968 = vmatmul.mubr.msk.bf16.gmra.mxu1 %vm1336_vm0, %v1543_v1  ;;  %v1591_v31 = vrot.slane %v1577_v24, %v5384_v7  ;;  %v1953_v39 = vcombine.low %v6166_v41, %v6170_v60  ;;  %v1954_v1 = vcombine.low %v1945_v45, %v6174_v35  ;;  %v4684_v11 = vcombine.high %v5960_v47, %v5964_v51 }
  0x79   : > { %4994 = vmatmul.mubr.msk.bf16.vlgmr.msra.gmra.mxu0 %vm1336_vm0, %v1920_v14  ;;  %7582 = vst [vmem:[#allocation79_spill] sm:$0xff] %v6178_v17  ;;  %4971 = vmatprep.mubr.msk.bf16.mxu1 %vm5301_vm2, %v7525_v59  ;;  %v6200_v32 = vrot.slane %v1593_v38, %v5384_v7  ;;  %v6207_v15 = vrot.slane %v1595_v3, %v5384_v7 }
  0x7a   : > { %5052 = vmatpush3.bf16.msra.mxu0 %v5254_v34  ;;  %4997 = vmatprep.mubr.msk.bf16.mxu0 %vm5301_vm2, %v7525_v59  ;;  %v1961_v46 = vrot.slane %v1953_v39, %v5384_v7  ;;  %v1968_v21 = vrot.slane %v1954_v1, %v5384_v7  ;;  %v1592_v10 = vcombine.low %v6178_v17, %v1591_v31 }
  0x7b   : > { %5111 = vmatprep.subr.bf16.mxu0 %v7525_v59  ;;  %7583 = vst [vmem:[#allocation80_spill] sm:$0xff] %v6200_v32  ;;  %v6204_v34 = vrot.slane %v1594_v58, %v5384_v7  ;;  %7585 = vst [vmem:[#allocation82_spill] sm:$0xff] %v6207_v15  ;;  %v6210_v14 = vrot.slane %v4684_v11, %v5384_v7  ;;  %v1970_v24 = vcombine.low %v5797_v12, %v5810_v56  ;;  %v7589_v11 = vld [vmem:[#allocation3_spill] sm:$0xff] }
  0x7c   : > { %v1969_v29 = vcombine.low %v1961_v46, %v1968_v21  ;;  %v1971_v19 = vcombine.low %v5818_v52, %v5824_v36  ;;  %v7586_v20 = vcombine.low %v5468_v54, %v5624_v40  ;;  %v7587_v31 = vcombine.low %v5641_v55, %v5650_v13 }
  0x7d   : > { %7584 = vst [vmem:[#allocation81_spill] sm:$0xff] %v6204_v34  ;;  %v1625_v39 = vcombine.low %v6200_v32, %v6204_v34  ;;  %v1972_v12 = vcombine.low %v5838_v2, %v5834_v50  ;;  %v1626_v36 = vcombine.low %v6207_v15, %v6210_v14  ;;  %v4698_v54 = vcombine.high %v5827_v37, %v5834_v50  ;;  %v7603_v32 = vld [vmem:[#allocation21_spill] sm:$0xff] }
  0x7e   : > { %v6220_v45 = vrot.slane %v7586_v20, %v5384_v7  ;;  %v6226_v38 = vrot.slane %v7587_v31, %v5384_v7  ;;  %v6238_v40 = vrot.slane %v1970_v24, %v5384_v7  ;;  %v6241_v55 = vrot.slane %v1971_v19, %v5384_v7  ;;  %v7591_v24 = vld [vmem:[#allocation7_spill] sm:$0xff] }
  0x7f   : > { %v6247_v13 = vrot.slane %v1625_v39, %v5384_v7  ;;  %v6250_v2 = vrot.slane %v1972_v12, %v5384_v7  ;;  %v1642_v1 = vcombine.low %v5472_v57, %v5478_v62  ;;  %v1640_v58 = vrot.slane %v1626_v36, %v5384_v7 }
  0x80   : > { %4972 = vmatmul.mubr.msk.bf16.gmra.mxu1 %vm1336_vm0, %v1592_v10  ;;  %v6258_v3 = vrot.slane %v4698_v54, %v5384_v7  ;;  %v2002_v46 = vcombine.low %v6238_v40, %v6241_v55  ;;  %v1643_v21 = vcombine.low %v5482_v63, %v5485_v0  ;;  %v1644_v10 = vcombine.low %v7589_v11, %v5496_v8 }
  0x81   : > { %4998 = vmatmul.mubr.msk.bf16.gmra.mxu0 %vm1336_vm0, %v1969_v29  ;;  %7588 = vst [vmem:[#allocation83_spill] sm:$0xff] %v6247_v13  ;;  %4975 = vmatprep.mubr.msk.bf16.mxu1 %vm5301_vm2, %v7525_v59  ;;  %v7590_v29 = vld [vmem:[#allocation4_spill] sm:$0xff]  ;;  %v6269_v20 = vrot.slane %v1642_v1, %v5384_v7  ;;  %v2019_v31 = vcombine.low %v5948_v9, %v5952_v53 }
  0x82   : > { %5001 = vmatprep.mubr.msk.bf16.mxu0 %vm5301_vm2, %v7525_v59  ;;  %v1645_v19 = vcombine.low %v7591_v24, %v7590_v29  ;;  %v1641_v39 = vcombine.low %v6247_v13, %v1640_v58  ;;  %v2003_v12 = vcombine.low %v6250_v2, %v6258_v3  ;;  %v2010_v36 = vrot.slane %v2002_v46, %v5384_v7  ;;  %v7597_v13 = vld [vmem:[#allocation27_spill] sm:$0xff] }
  0x83   : > { %v6278_v54 = vrot.slane %v1643_v21, %v5384_v7  ;;  %v6281_v8 = vrot.slane %v1644_v10, %v5384_v7  ;;  %v4699_v1 = vcombine.high %v5948_v9, %v5952_v53  ;;  %v2021_v58 = vcombine.low %v5964_v51, %v5978_v30  ;;  %v7594_v53 = vld [vmem:[#allocation25_spill] sm:$0xff] }
  0x84   : > { %v6284_v24 = vrot.slane %v1645_v19, %v5384_v7  ;;  %v2017_v61 = vrot.slane %v2003_v12, %v5384_v7  ;;  %v2022_v21 = vcombine.low %v5983_v48, %v5472_v57  ;;  %v6296_v10 = vrot.slane %v2019_v31, %v5384_v7  ;;  %v7595_v30 = vld [vmem:[#allocation5_spill] sm:$0xff] }
  0x85   : > { %v1674_v46 = vcombine.low %v6269_v20, %v6278_v54  ;;  %v6301_v42 = vrot.slane %v4699_v1, %v5384_v7  ;;  %v6304_v9 = vrot.slane %v2021_v58, %v5384_v7  ;;  %v1691_v12 = vcombine.low %v7595_v30, %v7594_v53  ;;  %v7596_v31 = vld [vmem:[#allocation29_spill] sm:$0xff] }
  0x86   : > { %7592 = vst [vmem:[#allocation3_spill] sm:$0xff] %v6284_v24  ;;  %v1675_v19 = vcombine.low %v6281_v8, %v6284_v24  ;;  %v2018_v16 = vcombine.low %v2010_v36, %v2017_v61  ;;  %v6310_v48 = vrot.slane %v2022_v21, %v5384_v7  ;;  %v1692_v34 = vcombine.low %v7597_v13, %v7596_v31  ;;  %v7599_v61 = vld [vmem:[#allocation32_spill] sm:$0xff] }
  0x87   : > { %7593 = vst [vmem:[#allocation4_spill] sm:$0xff] %v6301_v42  ;;  %v1682_v5 = vrot.slane %v1674_v46, %v5384_v7  ;;  %v2051_v58 = vcombine.low %v6296_v10, %v6301_v42  ;;  %v4685_v15 = vcombine.high %v7597_v13, %v7596_v31  ;;  %v7600_v36 = vld [vmem:[#allocation28_spill] sm:$0xff]  ;;  %v6330_v21 = vrot.slane %v1691_v12, %v5384_v7 }
  0x88   : > { %4976 = vmatmul.mubr.msk.bf16.gmra.mxu1 %vm1336_vm0, %v1641_v39  ;;  %v6316_v1 = vrot.slane %v1675_v19, %v5384_v7  ;;  %v1694_v46 = vcombine.low %v7600_v36, %v7599_v61  ;;  %v2052_v39 = vcombine.low %v6304_v9, %v6310_v48  ;;  %v6333_v19 = vrot.slane %v1692_v34, %v5384_v7  ;;  %v7602_v42 = vld [vmem:[#allocation20_spill] sm:$0xff] }
  0x89   : > { %5002 = vmatmul.mubr.msk.bf16.gmra.mxu0 %vm1336_vm0, %v2018_v16  ;;  %4979 = vmatprep.mubr.msk.bf16.mxu1 %vm5301_vm2, %v7525_v59  ;;  %v7604_v17 = vcombine.low %v7602_v42, %v7603_v32  ;;  %v2059_v16 = vrot.slane %v2051_v58, %v5384_v7  ;;  %v6343_v43 = vrot.slane %v4685_v15, %v5384_v7  ;;  %v7607_v42 = vld [vmem:[#allocation6_spill] sm:$0xff] }
  0x8a   : > { %7598 = vst [vmem:[#allocation7_spill] sm:$0xff] %v6316_v1  ;;  %7601 = vst [vmem:[#allocation25_spill] sm:$0xff] %v6333_v19  ;;  %5005 = vmatprep.mubr.msk.bf16.mxu0 %vm5301_vm2, %v7525_v59  ;;  %v6346_v51 = vrot.slane %v1694_v46, %v5384_v7  ;;  %v1690_v12 = vcombine.low %v1682_v5, %v6316_v1  ;;  %v2066_v34 = vrot.slane %v2052_v39, %v5384_v7  ;;  %v7608_v46 = vld [vmem:[#allocation22_spill] sm:$0xff]  ;;  %v7609_v39 = vld [vmem:[#allocation23_spill] sm:$0xff] }
  0x8b   : > { %v2761_v28 = vrot.slane %v7604_v17, %v5384_v7  ;;  %7605 = vst [vmem:[#allocation5_spill] sm:$0xff] %v6343_v43  ;;  %v2068_v26 = vcombine.low %v5478_v62, %v5482_v63  ;;  %v2069_v17 = vcombine.low %v7607_v42, %v7589_v11  ;;  %v1723_v32 = vcombine.low %v6330_v21, %v6333_v19 }
  0x8c   : > { %7606 = vst [vmem:[#allocation29_spill] sm:$0xff] %v6346_v51  ;;  %v1724_v15 = vcombine.low %v6343_v43, %v6346_v51  ;;  %v4700_v58 = vcombine.high %v5485_v0, %v7589_v11  ;;  %v2071_v5 = vcombine.low %v7590_v29, %v7595_v30  ;;  %v7610_v56 = vcombine.low %v7608_v46, %v7609_v39 }
  0x8d   : > { %v2067_v52 = vcombine.low %v2059_v16, %v2066_v34  ;;  %v6367_v42 = vrot.slane %v2068_v26, %v5384_v7  ;;  %v6370_v1 = vrot.slane %v2069_v17, %v5384_v7  ;;  %v2360_v51 = vcombine.low %v5408_v18, %v5429_v25  ;;  %v7612_v16 = vld [vmem:[#allocation31_spill] sm:$0xff]  ;;  %v7613_v18 = vld [vmem:[#allocation34_spill] sm:$0xff] }
  0x8e   : > { %v2768_v63 = vrot.slane %v7610_v56, %v5384_v7  ;;  %v2361_v19 = vcombine.low %v5611_v33, %v5600_v27  ;;  %v6377_v43 = vrot.slane %v4700_v58, %v5384_v7  ;;  %v6380_v24 = vrot.slane %v2071_v5, %v5384_v7  ;;  %v7614_v58 = vld [vmem:[#allocation33_spill] sm:$0xff] }
  0x8f   : > { %7611 = vst [vmem:[#allocation27_spill] sm:$0xff] %v6370_v1  ;;  %v2100_v56 = vcombine.low %v6367_v42, %v6370_v1  ;;  %v4701_v26 = vcombine.high %v7590_v29, %v7595_v30  ;;  %v2118_v34 = vcombine.low %v7596_v31, %v7612_v16  ;;  %v2119_v25 = vcombine.low %v7613_v18, %v7600_v36  ;;  %v4710_v18 = vld.sshfl [vmem:[%s5389_s30 + $0x38] sm:$0x33 pattern:$0x75316420] }
  0x90   : > { %4980 = vmatmul.mubr.msk.bf16.gmra.mxu1 %vm1336_vm0, %v1690_v12  ;;  %v1731_v27 = vrot.slane %v1723_v32, %v5384_v7  ;;  %v6393_v33 = vrot.slane %v1724_v15, %v5384_v7  ;;  %v2101_v17 = vcombine.low %v6377_v43, %v6380_v24  ;;  %v2120_v5 = vcombine.low %v7599_v61, %v7614_v58 }
  0x91   : > { %5006 = vmatmul.mubr.msk.bf16.gmra.mxu0 %vm1336_vm0, %v2067_v52  ;;  %4983 = vmatprep.mubr.msk.bf16.mxu1 %vm5301_vm2, %v7525_v59  ;;  %v2108_v29 = vrot.slane %v2100_v56, %v5384_v7  ;;  %v6404_v30 = vrot.slane %v4701_v26, %v5384_v7  ;;  %v6407_v12 = vrot.slane %v2118_v34, %v5384_v7 }
  0x92   : > { %5009 = vmatprep.mubr.msk.bf16.mxu0 %vm5301_vm2, %v7525_v59  ;;  %v2115_v32 = vrot.slane %v2101_v17, %v5384_v7  ;;  %v6413_v15 = vrot.slane %v2119_v25, %v5384_v7  ;;  %v6416_v52 = vrot.slane %v2120_v5, %v5384_v7  ;;  %v2368_v46 = vrot.slane %v2360_v51, %v5384_v7 }
  0x93   : > { %v2401_v39 = vcombine.low %v6174_v35, %v6238_v40  ;;  %v2375_v56 = vrot.slane %v2361_v19, %v5384_v7  ;;  %v1739_v26 = vcombine.low %v1731_v27, %v6393_v33  ;;  %v4144_v16 = vcombine.low %v6241_v55, %v6250_v2 }
  0x94   : > { %v2769_v34 = vcombine.low %v6220_v45, %v6226_v38  ;;  %v2116_v25 = vcombine.low %v2108_v29, %v2115_v32  ;;  %v2149_v17 = vcombine.low %v6404_v30, %v6407_v12  ;;  %v2150_v51 = vcombine.low %v6413_v15, %v6416_v52 }
  0x95   : > { %v2770_v5 = vcombine.low %v2761_v28, %v2768_v63  ;;  %v6433_v35 = vrot.slane %v2401_v39, %v5384_v7  ;;  %v6436_v40 = vrot.slane %v4144_v16, %v5384_v7  ;;  %v2418_v45 = vcombine.low %v5957_v49, %v5960_v47  ;;  %v7616_v16 = vld [vmem:[#allocation57_spill] sm:$0xff]  ;;  %v7621_v63 = vld [vmem:[#allocation70_spill] sm:$0xff] }
  0x96   : > { %v6439_v2 = vrot.slane %v2769_v34, %v5384_v7  ;;  %v2317_v19 = vcombine.high %v4710_v18, %v4710_v18  ;;  %v1746_v28 = vrot.slane %v7614_v58, %v5384_v7  ;;  %v2157_v27 = vrot.slane %v2149_v17, %v5384_v7  ;;  %v7622_v47 = vld [vmem:[#allocation69_spill] sm:$0xff] }
  0x97   : > { %7615 = vst [vmem:[#allocation32_spill] sm:$0xff] %v6436_v40  ;;  %v6444_v38 = vrot.slane %v2770_v5, %v5384_v7  ;;  %v2164_v49 = vrot.slane %v2150_v51, %v5384_v7  ;;  %v2376_v29 = vcombine.low %v2368_v46, %v6166_v41  ;;  %v2377_v32 = vcombine.low %v6170_v60, %v2375_v56  ;;  %v7617_v46 = vld [vmem:[#allocation66_spill] sm:$0xff]  ;;  %v7618_v60 = vld [vmem:[#allocation65_spill] sm:$0xff] }
  0x98   : > { %4984 = vmatmul.mubr.msk.bf16.gmra.mxu1 %vm1336_vm0, %v1739_v26  ;;  %v2393_v39 = vcombine.low %v5827_v37, %v5834_v50  ;;  %v1753_v26 = vrot.slane %v1746_v28, %v5384_v7  ;;  %v2835_v34 = vcombine.low %v7616_v16, %v5987_v23  ;;  %v6471_v17 = vrot.slane %v2317_v19, %v5384_v7  ;;  %v7619_v37 = vld [vmem:[#allocation68_spill] sm:$0xff]  ;;  %v7620_v50 = vld [vmem:[#allocation67_spill] sm:$0xff]  ;;  %v4711_v40 = vld.sshfl [vmem:[%s5389_s30 + $0x3c] sm:$0x33 pattern:$0x75316420] }
  0x99   : > { %5010 = vmatmul.mubr.msk.bf16.gmra.mxu0 %vm1336_vm0, %v2116_v25  ;;  %4987 = vmatprep.mubr.msk.bf16.mxu1 %vm5301_vm2, %v7525_v59  ;;  %v6468_v25 = vrot.slane %v4710_v18, %v5384_v7  ;;  %v2165_v41 = vcombine.low %v2157_v27, %v2164_v49  ;;  %v2836_v56 = vcombine.low %v7618_v60, %v7617_v46  ;;  %v7623_v18 = vld [vmem:[#allocation56_spill] sm:$0xff] }
  0x9a   : > { %5013 = vmatprep.mubr.msk.bf16.mxu0 %vm5301_vm2, %v7525_v59  ;;  %v2384_v51 = vrot.slane %v2376_v29, %v5384_v7  ;;  %v2391_v5 = vrot.slane %v2377_v32, %v5384_v7  ;;  %v2837_v28 = vcombine.low %v7620_v50, %v7619_v37  ;;  %v2838_v23 = vcombine.low %v7622_v47, %v7621_v63  ;;  %v7624_v32 = vld [vmem:[#allocation49_spill] sm:$0xff]  ;;  %v7625_v46 = vld [vmem:[#allocation24_spill] sm:$0xff]  ;;  %v7626_v47 = vld [vmem:[#allocation51_spill] sm:$0xff] }
  0x9b   : > { %v2172_v16 = vrot.slane %v7623_v18, %v5384_v7  ;;  %v2400_v19 = vrot.slane %v2393_v39, %v5384_v7  ;;  %v2845_v27 = vrot.slane %v2835_v34, %v5384_v7  ;;  %v2852_v49 = vrot.slane %v2836_v56, %v5384_v7  ;;  %v7627_v39 = vld [vmem:[#allocation50_spill] sm:$0xff]  ;;  %v7629_v50 = vld [vmem:[#allocation52_spill] sm:$0xff] }
  0x9c   : > { %v2425_v29 = vrot.slane %v2418_v45, %v5384_v7  ;;  %v2786_v60 = vcombine.low %v7625_v46, %v7624_v32  ;;  %v2859_v37 = vrot.slane %v2837_v28, %v5384_v7  ;;  %v2866_v63 = vrot.slane %v2838_v23, %v5384_v7  ;;  %v7628_v45 = vld [vmem:[#allocation53_spill] sm:$0xff]  ;;  %v7630_v32 = vld [vmem:[#allocation55_spill] sm:$0xff]  ;;  %v7631_v23 = vld [vmem:[#allocation54_spill] sm:$0xff] }
  0x9d   : > { %v2787_v34 = vcombine.low %v7627_v39, %v7626_v47  ;;  %v2867_v56 = vcombine.low %v2845_v27, %v2852_v49  ;;  %v2788_v28 = vcombine.low %v7629_v50, %v7628_v45  ;;  %v2789_v46 = vcombine.low %v7631_v23, %v7630_v32 }
  0x9e   : > { %v4171_v1 = vcombine.low %v6380_v24, %v6404_v30  ;;  %v2179_v47 = vrot.slane %v2172_v16, %v5384_v7  ;;  %v2392_v27 = vcombine.low %v2384_v51, %v2391_v5  ;;  %v2402_v49 = vcombine.low %v6241_v55, %v2400_v19  ;;  %v5255_v51 = vld [vmem:[%s7388_s1 + $0x28] sm:$0xff]  }
  0x9f   : > { %v2427_v55 = vcombine.low %v2425_v29, %v6304_v9  ;;  %v2796_v5 = vrot.slane %v2786_v60, %v5384_v7  ;;  %v2803_v16 = vrot.slane %v2787_v34, %v5384_v7  ;;  %v2817_v19 = vrot.slane %v2789_v46, %v5384_v7 }
  0xa0   : > { %4988 = vmatmul.mubr.msk.bf16.gmra.mxu1 %vm1336_vm0, %v1753_v26  ;;  %v2477_v26 = vcombine.low %v6407_v12, %v6413_v15  ;;  %v6511_v12 = vrot.slane %v2867_v56, %v5384_v7  ;;  %v2426_v15 = vcombine.low %v6258_v3, %v6296_v10  ;;  %v6522_v30 = vrot.slane %v4171_v1, %v5384_v7 }
  0xa1   : > { %5014 = vmatmul.mubr.msk.bf16.gmra.mxu0 %vm1336_vm0, %v2165_v41  ;;  %5023 = vmatprep.mubr.msk.bf16.mxu1 %vm5301_vm2, %v7525_v59  ;;  %v2868_v41 = vcombine.low %v2859_v37, %v2866_v63  ;;  %v2341_v3 = vcombine.high %v4711_v40, %v4711_v40  ;;  %v2810_v10 = vrot.slane %v2788_v28, %v5384_v7  ;;  %v7652_v63 = vld [vmem:[#allocation38_spill] sm:$0xff] }
  0xa2   : > { %5017 = vmatprep.mubr.msk.bf16.mxu0 %vm5301_vm2, %v7525_v59  ;;  %v6519_v37 = vrot.slane %v2477_v26, %v5384_v7  ;;  %7632 = vst [vmem:[#allocation28_spill] sm:$0xff] %v6522_v30  ;;  %v6537_v56 = vrot.slane %v4711_v40, %v5384_v7  ;;  %v2416_v60 = vrot.slane %v2402_v49, %v5384_v7  ;;  %v2686_v49 = vshrl.u32 %v6471_v17, 16  ;;  %v7653_v30 = vld [vmem:[#allocation41_spill] sm:$0xff] }
  0xa3   : > { %v6516_v39 = vrot.slane %v2868_v41, %v5384_v7  ;;  %v6540_v29 = vrot.slane %v2341_v3, %v5384_v7  ;;  %v6545_v34 = vrot.slane %v2426_v15, %v5384_v7  ;;  %v2443_v26 = vcombine.low %v5485_v0, %v7589_v11  ;;  %v5256_v15 = vld [vmem:[%s7388_s1 + $0x30] sm:$0xff]  }
  0xa4   : > { %v4714_v45 = vcombine.high %v6468_v25, %v6471_v17  ;;  %v6553_v40 = vrot.slane %v2427_v55, %v5384_v7  ;;  %v4180_v28 = vcombine.low %v7623_v18, %v6471_v17  ;;  %v2818_v0 = vcombine.low %v2796_v5, %v2803_v16 }
  0xa5   : > { %7633 = vst [vmem:[#allocation20_spill] sm:$0xff] %v6545_v34  ;;  %v2495_v50 = vcombine.low %v6537_v56, %v6540_v29  ;;  %v2819_v11 = vcombine.low %v2810_v10, %v2817_v19  ;;  %v2417_v41 = vcombine.low %v6433_v35, %v2416_v60  ;;  %v2451_v18 = vcombine.low %v6310_v48, %v6367_v42  ;;  %v7635_v19 = vld [vmem:[#allocation8_spill] sm:$0xff]  ;;  %v7636_v60 = vld [vmem:[#allocation71_spill] sm:$0xff] }
  0xa6   : > { %v2509_v32 = vrot.slane %v4714_v45, %v5384_v7  ;;  %v4187_v46 = vrot.slane %v4180_v28, %v5384_v7  ;;  %v2826_v55 = vrot.slane %v2818_v0, %v5384_v7  ;;  %v2450_v16 = vrot.slane %v2443_v26, %v5384_v7  ;;  %v7638_v26 = vld [vmem:[#allocation9_spill] sm:$0xff] }
  0xa7   : > { %v2516_v23 = vrot.slane %v2495_v50, %v5384_v7  ;;  %v2833_v5 = vrot.slane %v2819_v11, %v5384_v7  ;;  %v2468_v48 = vcombine.low %v7594_v53, %v7597_v13  ;;  %v6590_v10 = vcombine.high %v6468_v25, %v6468_v25 }
  0xa8   : > { %5024 = vmatmul.mubr.msk.bf16.vlgmr.msra.gmra.mxu1 %vm1336_vm0, %v2392_v27  ;;  %v4188_v27 = vcombine.low %v6416_v52, %v4187_v46  ;;  %v2884_v45 = vcombine.low %v7636_v60, %v7635_v19  ;;  %v6599_v13 = vcombine.high %v6471_v17, %v6471_v17  ;;  %v2707_v53 = vshll.u32 %v6537_v56, 16  ;;  %v7640_v46 = vld [vmem:[#allocation12_spill] sm:$0xff] }
  0xa9   : > { %5018 = vmatmul.mubr.msk.bf16.gmra.mxu0 %vm1336_vm0, %v2179_v47  ;;  %5082 = vmatpush3.bf16.msra.mxu1 %v5255_v51  ;;  %v2518_v47 = vcombine.low %v2509_v32, %v2516_v23  ;;  %v2442_v51 = vcombine.low %v6545_v34, %v6553_v40  ;;  %v7637_v40 = vld [vmem:[#allocation10_spill] sm:$0xff]  ;;  %v7639_v28 = vcombine.low %v6439_v2, %v6444_v38  ;;  %v2691_v11 = vshll.u32 %v6590_v10, 16  ;;  %v7641_v2 = vld [vmem:[#allocation11_spill] sm:$0xff]  ;;  %v7654_v34 = vld [vmem:[#allocation40_spill] sm:$0xff] }
  0xaa   : > { %5027 = vmatprep.mubr.msk.bf16.mxu1 %vm5301_vm2, %v7525_v59  ;;  %5053 = vmatprep.mubr.msk.bf16.mxu0 %vm5301_vm2, %v7525_v59  ;;  %v6586_v3 = vrot.slane %v4188_v27, %v5384_v7  ;;  %v2885_v50 = vcombine.low %v7638_v26, %v7637_v40  ;;  %v2710_v32 = vshrl.u32 %v6537_v56, 16  ;;  %v2715_v23 = vshll.u32 %v6540_v29, 16 }
  0xab   : > { %5141 = vmatprep.subr.bf16.mxu1 %v7525_v59  ;;  %v6583_v42 = vrot.slane %v2518_v47, %v5384_v7  ;;  %v2886_v38 = vcombine.low %v7641_v2, %v7640_v46  ;;  %v7643_v47 = vld [vmem:[#allocation13_spill] sm:$0xff]  ;;  %v2694_v19 = vshrl.u32 %v6590_v10, 16  ;;  %v2699_v60 = vshll.u32 %v6599_v13, 16 }
  0xac   : > { %7634 = vst [vmem:[#allocation21_spill] sm:$0xff] %v6586_v3  ;;  %v2834_v40 = vcombine.low %v2826_v55, %v2833_v5  ;;  %v2452_v26 = vcombine.low %v2450_v16, %v6377_v43  ;;  %v2475_v46 = vrot.slane %v2468_v48, %v5384_v7  ;;  %v2894_v2 = vrot.slane %v2884_v45, %v5384_v7 }
  0xad   : > { %v6636_v55 = vsel %vm5418_vm15, %v2694_v19, %v2699_v60  ;;  %v2901_v5 = vrot.slane %v2885_v50, %v5384_v7  ;;  %v6645_v0 = vsel %vm5418_vm15, %v2710_v32, %v2715_v23  ;;  %v6655_v50 = vcombine.high %v6540_v29, %v6540_v29 }
  0xae   : > { %v7645_v23 = vcombine.low %v6083_v22, %v6131_v4  ;;  %v2466_v60 = vrot.slane %v2452_v26, %v5384_v7  ;;  %v7646_v1 = vcombine.low %v6134_v6, %v6137_v44  ;;  %v2476_v22 = vcombine.low %v6380_v24, %v2475_v46  ;;  %v7647_v26 = vld [vmem:[#allocation35_spill] sm:$0xff]  ;;  %v7649_v44 = vld [vmem:[#allocation37_spill] sm:$0xff] }
  0xaf   : > { %v2493_v4 = vcombine.low %v6468_v25, %v6471_v17  ;;  %v2936_v24 = vcombine.low %v7654_v34, %v7653_v30 }
  0xb0   : > { %5028 = vmatmul.mubr.msk.bf16.gmra.mxu1 %vm1336_vm0, %v2417_v41  ;;  %v7642_v41 = vld [vmem:[#allocation14_spill] sm:$0xff] }
  0xb1   : > { %5054 = vmatmul.mubr.msk.bf16.vlgmr.msra.gmra.mxu0 %vm1336_vm0, %v7639_v28  ;;  %5031 = vmatprep.mubr.msk.bf16.mxu1 %vm5301_vm2, %v7525_v59  ;;  %v2887_v27 = vcombine.low %v7643_v47, %v7642_v41  ;;  %v6624_v28 = vcombine.high %v6537_v56, %v6537_v56  ;;  %v6632_v47 = vsel %vm5418_vm15, %v2686_v49, %v2691_v11 }
  0xb2   : > { %5112 = vmatpush3.bf16.msra.mxu0 %v5256_v15  ;;  %5057 = vmatprep.mubr.msk.bf16.mxu0 %vm5301_vm2, %v7525_v59  ;;  %v2702_v15 = vshrl.u32 %v6599_v13, 16  ;;  %v2908_v49 = vrot.slane %v2886_v38, %v5384_v7  ;;  %v6664_v38 = vrot.slane %v7645_v23, %v5384_v7  ;;  %v6676_v11 = vrot.slane %v7646_v1, %v5384_v7  ;;  %v7648_v23 = vld [vmem:[#allocation15_spill] sm:$0xff]  ;;  %v7650_v1 = vld [vmem:[#allocation36_spill] sm:$0xff] }
  0xb3   : > { %5171 = vmatprep.subr.bf16.mxu0 %v7525_v59  ;;  %v2915_v45 = vrot.slane %v2887_v27, %v5384_v7  ;;  %v2723_v19 = vshll.u32 %v6624_v28, 16  ;;  %v2726_v32 = vshrl.u32 %v6624_v28, 16  ;;  %v6668_v27 = vrot.slane %v2451_v18, %v5384_v7 }
  0xb4   : > { %v6641_v16 = vsel %vm5418_vm15, %v2702_v15, %v2707_v53  ;;  %v2718_v53 = vshrl.u32 %v6540_v29, 16  ;;  %v2731_v15 = vshll.u32 %v6655_v50, 16  ;;  %v2916_v18 = vcombine.low %v2894_v2, %v2901_v5 }
  0xb5   : > { %v2933_v6 = vcombine.low %v7648_v23, %v7647_v26  ;;  %v2934_v48 = vcombine.low %v7650_v1, %v7649_v44  ;;  %v2678_v5 = vshrl.u32 %v6468_v25, 16  ;;  %v2484_v26 = vrot.slane %v2476_v22, %v5384_v7  ;;  %v7656_v1 = vld [vmem:[#allocation30_spill] sm:$0xff] }
  0xb6   : > { %v6696_v46 = vsel %vm5418_vm15, %v2718_v53, %v2723_v19  ;;  %v6700_v2 = vsel %vm5418_vm15, %v2726_v32, %v2731_v15  ;;  %v2502_v30 = vrot.slane %v2493_v4, %v5384_v7  ;;  %v3520_v34 = vcombine.low %v6664_v38, %v6676_v11 }
  0xb7   : > { %v2924_v53 = vrot.slane %v2916_v18, %v5384_v7  ;;  %v2943_v32 = vrot.slane %v2933_v6, %v5384_v7  ;;  %v2964_v23 = vrot.slane %v2936_v24, %v5384_v7  ;;  %v4743_v22 = vcombine.high %v5472_v57, %v5478_v62  ;;  %v7657_v24 = vld [vmem:[#allocation3_spill] sm:$0xff] }
  0xb8   : > { %5032 = vmatmul.mubr.msk.bf16.gmra.mxu1 %vm1336_vm0, %v2442_v51  ;;  %v2917_v51 = vcombine.low %v2908_v49, %v2915_v45  ;;  %v2467_v49 = vcombine.low %v6668_v27, %v2466_v60  ;;  %v3950_v45 = vcombine.low %v6696_v46, %v6700_v2  ;;  %v2950_v60 = vrot.slane %v2934_v48, %v5384_v7 }
  0xb9   : > { %5058 = vmatmul.mubr.msk.bf16.gmra.mxu0 %vm1336_vm0, %v2834_v40  ;;  %5035 = vmatprep.mubr.msk.bf16.mxu1 %vm5301_vm2, %v7525_v59  ;;  %v7651_v40 = vld [vmem:[#allocation39_spill] sm:$0xff]  ;;  %v3538_v4 = vcombine.low %v6210_v14, %v6269_v20  ;;  %v2517_v48 = vcombine.low %v6416_v52, %v2502_v30  ;;  %v3234_v62 = vrot.slane %v4743_v22, %v5384_v7 }
  0xba   : > { %5061 = vmatprep.mubr.msk.bf16.mxu0 %vm5301_vm2, %v7525_v59  ;;  %v2935_v3 = vcombine.low %v7652_v63, %v7651_v40  ;;  %v2683_v63 = vshll.u32 %v6471_v17, 16  ;;  %v2931_v19 = vrot.slane %v2917_v51, %v5384_v7  ;;  %v7655_v51 = vcombine.low %v6511_v12, %v6516_v39 }
  0xbb   : > { %v3539_v6 = vcombine.low %v6278_v54, %v6281_v8  ;;  %v6738_v12 = vrot.slane %v3538_v4, %v5384_v7  ;;  %v2965_v39 = vcombine.low %v2943_v32, %v2950_v60  ;;  %v3244_v40 = vcombine.low %v7656_v1, %v7596_v31  ;;  %v7659_v54 = vld [vmem:[#allocation25_spill] sm:$0xff] }
  0xbc   : > { %v2957_v15 = vrot.slane %v2935_v3, %v5384_v7  ;;  %v2685_v18 = vsel %vm5418_vm15, %v2678_v5, %v2683_v63  ;;  %v2492_v3 = vcombine.low %v2484_v26, %v6519_v37  ;;  %v2932_v57 = vcombine.low %v2924_v53, %v2931_v19  ;;  %v7658_v26 = vld [vmem:[#allocation5_spill] sm:$0xff] }
  0xbd   : > { %v3555_v52 = vcombine.low %v7657_v24, %v6330_v21  ;;  %v2983_v5 = vcombine.low %v2685_v18, %v6632_v47  ;;  %v6747_v63 = vrot.slane %v3539_v6, %v5384_v7  ;;  %v3556_v8 = vcombine.low %v7659_v54, %v7658_v26  ;;  %v7663_v24 = vld [vmem:[#allocation7_spill] sm:$0xff] }
  0xbe   : > { %v2966_v44 = vcombine.low %v2957_v15, %v2964_v23  ;;  %v2984_v30 = vcombine.low %v6636_v55, %v6641_v16  ;;  %v2985_v53 = vcombine.low %v6645_v0, %v6696_v46  ;;  %v3251_v31 = vrot.slane %v3244_v40, %v5384_v7  ;;  %v7667_v54 = vld [vmem:[#allocation59_spill] sm:$0xff] }
  0xbf   : > { %v6757_v19 = vrot.slane %v3555_v52, %v5384_v7  ;;  %v6765_v60 = vrot.slane %v3556_v8, %v5384_v7  ;;  %v2525_v15 = vrot.slane %v2517_v48, %v5384_v7  ;;  %v2973_v23 = vrot.slane %v2965_v39, %v5384_v7  ;;  %v7668_v8 = vld [vmem:[#allocation60_spill] sm:$0xff] }
  0xc0   : > { %5036 = vmatmul.mubr.msk.bf16.gmra.mxu1 %vm1336_vm0, %v2467_v49  ;;  %v3235_v49 = vcombine.low %v6269_v20, %v3234_v62  ;;  %v3554_v20 = vcombine.low %v6738_v12, %v6747_v63  ;;  %v2980_v22 = vrot.slane %v2966_v44, %v5384_v7  ;;  %v3252_v4 = vcombine.low %v6330_v21, %v3251_v31  ;;  %v7661_v62 = vld [vmem:[#allocation62_spill] sm:$0xff]  ;;  %v7686_v12 = vld [vmem:[#allocation29_spill] sm:$0xff] }
  0xc1   : > { %5062 = vmatmul.mubr.msk.bf16.gmra.mxu0 %vm1336_vm0, %v7655_v51  ;;  %5039 = vmatprep.mubr.msk.bf16.mxu1 %vm5301_vm2, %v7525_v59  ;;  %v7660_v51 = vld [vmem:[#allocation42_spill] sm:$0xff]  ;;  %v2999_v40 = vrot.slane %v2983_v5, %v5384_v7  ;;  %v3571_v48 = vcombine.low %v6757_v19, %v6765_v60  ;;  %v3006_v21 = vrot.slane %v2984_v30, %v5384_v7 }
  0xc2   : > { %5065 = vmatprep.mubr.msk.bf16.mxu0 %vm5301_vm2, %v7525_v59  ;;  %v6760_v32 = vrot.slane %v3235_v49, %v5384_v7  ;;  %v7662_v6 = vcombine.low %v7660_v51, %v7661_v62  ;;  %v6787_v39 = vrot.slane %v3252_v4, %v5384_v7  ;;  %v7664_v44 = vld [vmem:[#allocation26_spill] sm:$0xff]  ;;  %v2981_v4 = vcombine.low %v2973_v23, %v2980_v22 }
  0xc3   : > { %v7665_v5 = vld [vmem:[#allocation58_spill] sm:$0xff]  ;;  %v3316_v60 = vrot.slane %v6655_v50, %v5384_v7 }
  0xc4   : > { %v2992_v1 = vrot.slane %v7662_v6, %v5384_v7  ;;  %v3243_v52 = vcombine.low %v6760_v32, %v7663_v24  ;;  %v7666_v49 = vcombine.low %v7664_v44, %v7665_v5  ;;  %v3260_v30 = vcombine.low %v6787_v39, %v6393_v33 }
  0xc5   : > { %v3909_v5 = vcombine.low %v7661_v62, %v2685_v18  ;;  %v7670_v62 = vld [vmem:[#allocation47_spill] sm:$0xff] }
  0xc6   : > { %v6793_v26 = vrot.slane %v7666_v49, %v5384_v7  ;;  %v3014_v51 = vcombine.low %v2992_v1, %v2999_v40  ;;  %v2540_v49 = vrot.slane %v6624_v28, %v5384_v7  ;;  %v7671_v1 = vld [vmem:[#allocation45_spill] sm:$0xff] }
  0xc7   : > { %v3918_v22 = vrot.slane %v3909_v5, %v5384_v7  ;;  %v4742_v40 = vcombine.high %v7671_v1, %v7670_v62  ;;  %v5257_v62 = vld [vmem:[%s7388_s1 + $0x38] sm:$0xff]   ;;  %v4785_v1 = vcombine.high %v6537_v56, %v6540_v29 }
  0xc8   : > { %5040 = vmatmul.mubr.msk.bf16.gmra.mxu1 %vm1336_vm0, %v2492_v3  ;;  %v3013_v3 = vrot.slane %v2985_v53, %v5384_v7  ;;  %v2533_v53 = vcombine.low %v2525_v15, %v6583_v42  ;;  %v3022_v15 = vrot.slane %v3014_v51, %v5384_v7  ;;  %v2547_v18 = vrot.slane %v2540_v49, %v5384_v7  ;;  %v7676_v49 = vld [vmem:[#allocation63_spill] sm:$0xff] }
  0xc9   : > { %5066 = vmatmul.mubr.msk.bf16.gmra.mxu0 %vm1336_vm0, %v2932_v57  ;;  %5043 = vmatprep.mubr.msk.bf16.mxu1 %vm5301_vm2, %v7525_v59  ;;  %v7669_v57 = vcombine.low %v7667_v54, %v7668_v8  ;;  %v7673_v8 = vcombine.low %v6641_v16, %v6645_v0  ;;  %v3200_v51 = vrot.slane %v4742_v40, %v5384_v7  ;;  %v7675_v16 = vld [vmem:[#allocation78_spill] sm:$0xff]  ;;  %v7678_v40 = vld [vmem:[#allocation76_spill] sm:$0xff] }
  0xca   : > { %5069 = vmatprep.mubr.msk.bf16.mxu0 %vm5301_vm2, %v7525_v59  ;;  %v3015_v6 = vcombine.low %v3006_v21, %v3013_v3  ;;  %v7672_v3 = vcombine.low %v6632_v47, %v6636_v55  ;;  %v3037_v47 = vrot.slane %v6700_v2, %v5384_v7 }
  0xcb   : > { %v6799_v31 = vrot.slane %v7669_v57, %v5384_v7  ;;  %v3932_v57 = vrot.slane %v7673_v8, %v5384_v7  ;;  %v3201_v5 = vcombine.low %v3200_v51, %v7675_v16  ;;  %v7682_v51 = vld [vmem:[#allocation80_spill] sm:$0xff] }
  0xcc   : > { %v3029_v23 = vrot.slane %v3015_v6, %v5384_v7  ;;  %v3925_v54 = vrot.slane %v7672_v3, %v5384_v7 }
  0xcd   : > { %v3857_v44 = vcombine.low %v6793_v26, %v6799_v31  ;;  %v7692_v26 = vld [vmem:[#allocation75_spill] sm:$0xff] }
  0xce   : > { %v3030_v21 = vcombine.low %v3022_v15, %v3029_v23  ;;  %v3934_v6 = vcombine.low %v3925_v54, %v3932_v57  ;;  %v7677_v15 = vld [vmem:[#allocation64_spill] sm:$0xff]  ;;  %v3208_v54 = vrot.slane %v3201_v5, %v5384_v7  ;;  %v7681_v57 = vld [vmem:[#allocation79_spill] sm:$0xff]  ;;  %v7684_v5 = vld [vmem:[#allocation81_spill] sm:$0xff] }
  0xcf   : > { %v3210_v23 = vcombine.low %v7677_v15, %v7676_v49  ;;  %v5258_v15 = vld [vmem:[%s7388_s1 + $0x40] sm:$0xff]  }
  0xd0   : > { %5044 = vmatmul.mubr.msk.bf16.gmra.mxu1 %vm1336_vm0, %v2533_v53  ;;  %v7674_v53 = vld [vmem:[#allocation48_spill] sm:$0xff]  ;;  %v6845_v0 = vrot.slane %v3934_v6, %v5384_v7  ;;  %v3521_v6 = vcombine.low %v7675_v16, %v7682_v51  ;;  %v3572_v51 = vcombine.low %v7614_v58, %v6468_v25 }
  0xd1   : > { %5070 = vmatmul.mubr.msk.bf16.gmra.mxu0 %vm1336_vm0, %v2981_v4  ;;  %5047 = vmatprep.mubr.msk.bf16.mxu1 %vm5301_vm2, %v7525_v59  ;;  %v3933_v4 = vcombine.low %v7674_v53, %v3918_v22  ;;  %v3217_v8 = vrot.slane %v3210_v23, %v5384_v7  ;;  %v3209_v53 = vcombine.low %v7681_v57, %v3208_v54 }
  0xd2   : > { %5073 = vmatprep.mubr.msk.bf16.mxu0 %vm5301_vm2, %v7525_v59  ;;  %v3262_v57 = vcombine.low %v6471_v17, %v6590_v10  ;;  %v3579_v58 = vrot.slane %v3572_v51, %v5384_v7 }
  0xd3   : > { %v6840_v55 = vrot.slane %v3933_v4, %v5384_v7  ;;  %v3218_v4 = vcombine.low %v3217_v8, %v6210_v14  ;;  %v3529_v14 = vrot.slane %v3521_v6, %v5384_v7  ;;  %v4744_v8 = vcombine.high %v7600_v36, %v7599_v61 }
  0xd4   : > { %v3278_v61 = vrot.slane %v3262_v57, %v5384_v7  ;;  %v3580_v63 = vcombine.low %v7686_v12, %v3579_v58  ;;  %v7688_v58 = vld [vmem:[#allocation61_spill] sm:$0xff] }
  0xd5   : > { %v3949_v22 = vcombine.low %v6840_v55, %v6845_v0  ;;  %v3225_v23 = vrot.slane %v3218_v4, %v5384_v7  ;;  %v3264_v4 = vcombine.low %v6540_v29, %v6624_v28 }
  0xd7   : > { %v3292_v17 = vrot.slane %v3264_v4, %v5384_v7 }
  0xd8   : > { %5048 = vmatmul.mubr.msk.bf16.gmra.mxu1 %vm1336_vm0, %v2547_v18  ;;  %v3044_v18 = vrot.slane %v3037_v47, %v5384_v7  ;;  %v7683_v47 = vld [vmem:[#allocation82_spill] sm:$0xff] }
  0xd9   : > { %5074 = vmatmul.mubr.msk.bf16.gmra.mxu0 %vm1336_vm0, %v3030_v21  ;;  %5083 = vmatprep.mubr.msk.bf16.mxu1 %vm5301_vm2, %v7525_v59  ;;  %v7679_v21 = vld [vmem:[#allocation77_spill] sm:$0xff]  ;;  %v3522_v49 = vcombine.low %v7684_v5, %v7683_v47 }
  0xda   : > { %5077 = vmatprep.mubr.msk.bf16.mxu0 %vm5301_vm2, %v7525_v59  ;;  %v7680_v3 = vcombine.low %v7678_v40, %v7679_v21 }
  0xdb   : > { %v3536_v16 = vrot.slane %v3522_v49, %v5384_v7  ;;  %v3271_v49 = vrot.slane %v4744_v8, %v5384_v7 }
  0xdd   : > { %v3537_v21 = vcombine.low %v3529_v14, %v3536_v16  ;;  %v3293_v24 = vcombine.low %v3271_v49, %v3278_v61 }
  0xe0   : > { %5084 = vmatmul.mubr.msk.bf16.vlgmr.msra.gmra.mxu1 %vm1336_vm0, %v7680_v3  ;;  %v4754_v3 = vld.sshfl [vmem:[%s5389_s30 + $0x44] sm:$0x33 pattern:$0x75316420] }
  0xe1   : > { %5078 = vmatmul.mubr.msk.bf16.gmra.mxu0 %vm1336_vm0, %v3044_v18  ;;  %5142 = vmatpush3.bf16.msra.mxu1 %v5257_v62  ;;  %v7685_v18 = vld [vmem:[#allocation83_spill] sm:$0xff]  ;;  %v3485_v47 = vcombine.high %v4754_v3, %v4754_v3  ;;  %v6935_v10 = vrot.slane %v4754_v3, %v5384_v7 }
  0xe2   : > { %5087 = vmatprep.mubr.msk.bf16.mxu1 %vm5301_vm2, %v7525_v59  ;;  %5113 = vmatprep.mubr.msk.bf16.mxu0 %vm5301_vm2, %v7525_v59  ;;  %v3226_v62 = vcombine.low %v7685_v18, %v3225_v23 }
  0xe3   : > { %v6989_v50 = vcombine.high %v6935_v10, %v6935_v10 }
  0xe8   : > { %5088 = vmatmul.mubr.msk.bf16.gmra.mxu1 %vm1336_vm0, %v3209_v53  ;;  %v3263_v53 = vcombine.low %v6599_v13, %v6537_v56  ;;  %v6938_v13 = vrot.slane %v3485_v47, %v5384_v7  ;;  %v3323_v47 = vrot.slane %v3316_v60, %v5384_v7 }
  0xe9   : > { %5114 = vmatmul.mubr.msk.bf16.vlgmr.msra.gmra.mxu0 %vm1336_vm0, %v3520_v34  ;;  %5091 = vmatprep.mubr.msk.bf16.mxu1 %vm5301_vm2, %v7525_v59  ;;  %v4753_v34 = vld.sshfl [vmem:[%s5389_s30 + $0x40] sm:$0x33 pattern:$0x75316420] }
  0xea   : > { %5172 = vmatpush3.bf16.msra.mxu0 %v5258_v15  ;;  %5117 = vmatprep.mubr.msk.bf16.mxu0 %vm5301_vm2, %v7525_v59  ;;  %v3461_v6 = vcombine.high %v4753_v34, %v4753_v34  ;;  %v6914_v5 = vrot.slane %v4753_v34, %v5384_v7  ;;  %v3285_v36 = vrot.slane %v3263_v53, %v5384_v7 }
  0xeb   : > { %v3599_v14 = vcombine.low %v6935_v10, %v6938_v13 }
  0xec   : > { %v6926_v25 = vrot.slane %v3461_v6, %v5384_v7 }
  0xee   : > { %v6891_v40 = vpop.f32.mrf.mxu0  ;;  %v3597_v15 = vcombine.low %v6914_v5, %v6926_v25  ;;  %v4757_v23 = vcombine.high %v6914_v5, %v6926_v25 }
  0xf0   : > { %v4935_v11 = vpop.f32.mrf.mxu0  ;;  %5092 = vmatmul.mubr.msk.bf16.gmra.mxu1 %vm1336_vm0, %v3226_v62  ;;  %v3301_v62 = vrot.slane %v3293_v24, %v5384_v7  ;;  %v3606_v33 = vrot.slane %v3597_v15, %v5384_v7  ;;  %v3613_v39 = vrot.slane %v4757_v23, %v5384_v7  ;;  %v7689_v24 = vld [vmem:[#allocation74_spill] sm:$0xff] }
  0xf1   : > { %5118 = vmatmul.mubr.msk.bf16.gmra.mxu0 %vm1336_vm0, %v3537_v21  ;;  %5095 = vmatprep.mubr.msk.bf16.mxu1 %vm5301_vm2, %v7525_v59  ;;  %v3588_v11 = vrot.slane %v3580_v63, %v5384_v7 }
  0xf2   : > { %v6894_v38 = vpop.f32.mrf.mxu0  ;;  %5121 = vmatprep.mubr.msk.bf16.mxu0 %vm5301_vm2, %v7525_v59  ;;  %v3621_v8 = vcombine.low %v3292_v17, %v3606_v33 }
  0xf4   : > { %v4936_v54 = vpop.f32.mrf.mxu0 }
  0xf8   : > { %5096 = vmatmul.mubr.msk.bf16.gmra.mxu1 %vm1336_vm0, %v3243_v52  ;;  %v3294_v52 = vcombine.low %v3285_v36, %v3292_v17  ;;  %v7687_v17 = vld [vmem:[#allocation72_spill] sm:$0xff] }
  0xf9   : > { %5122 = vmatmul.mubr.msk.bf16.gmra.mxu0 %vm1336_vm0, %v3554_v20  ;;  %5099 = vmatprep.mubr.msk.bf16.mxu1 %vm5301_vm2, %v7525_v59  ;;  %v3581_v20 = vcombine.low %v3278_v61, %v3285_v36  ;;  %v3644_v61 = vrot.slane %v6989_v50, %v5384_v7 }
  0xfa   : > { %5125 = vmatprep.mubr.msk.bf16.mxu0 %vm5301_vm2, %v7525_v59  ;;  %v3308_v21 = vrot.slane %v3294_v52, %v5384_v7  ;;  %v7690_v52 = vld [vmem:[#allocation73_spill] sm:$0xff] }
  0xfb   : > { %v6940_v28 = vpop.f32.mrf.mxu1  ;;  %v3595_v34 = vrot.slane %v3581_v20, %v5384_v7  ;;  %v3859_v12 = vcombine.low %v7690_v52, %v7689_v24  ;;  %v3651_v63 = vrot.slane %v3644_v61, %v5384_v7  ;;  %v3787_v61 = vshll.u32 %v6926_v25, 16  ;;  %v7698_v24 = vld [vmem:[#allocation43_spill] sm:$0xff] }
  0xfc   : > { %v3309_v3 = vcombine.low %v3301_v62, %v3308_v21  ;;  %v7699_v52 = vld [vmem:[#allocation19_spill] sm:$0xff] }
  0xfd   : > { %v4951_v32 = vpop.f32.mrf.mxu1  ;;  %v3596_v54 = vcombine.low %v3588_v11, %v3595_v34  ;;  %v7691_v11 = vld [vmem:[#allocation16_spill] sm:$0xff]  ;;  %v7694_v34 = vld [vmem:[#allocation17_spill] sm:$0xff] }
  0xfe   : > { %v3858_v32 = vcombine.low %v7688_v58, %v7687_v17  ;;  %v3875_v31 = vcombine.low %v7692_v26, %v7691_v11  ;;  %v3790_v17 = vshrl.u32 %v6926_v25, 16  ;;  %v7703_v26 = vld [vmem:[#allocation20_spill] sm:$0xff] }
  0xff   : > { %v6951_v16 = vpop.f32.mrf.mxu1 }
 0x100   : > { %5100 = vmatmul.mubr.msk.bf16.gmra.mxu1 %vm1336_vm0, %v3260_v30  ;;  %v3620_v30 = vrot.slane %v3599_v14, %v5384_v7  ;;  %v3866_v23 = vrot.slane %v3858_v32, %v5384_v7  ;;  %v3873_v14 = vrot.slane %v3859_v12, %v5384_v7  ;;  %v3892_v12 = vcombine.low %v7699_v52, %v7698_v24 }
 0x101   : > { %v4952_v18 = vpop.f32.mrf.mxu1  ;;  %5126 = vmatmul.mubr.msk.bf16.gmra.mxu0 %vm1336_vm0, %v3571_v48  ;;  %5103 = vmatprep.mubr.msk.bf16.mxu1 %vm5301_vm2, %v7525_v59  ;;  %v3629_v48 = vrot.slane %v3621_v8, %v5384_v7 }
 0x102   : > { %5129 = vmatprep.mubr.msk.bf16.mxu0 %vm5301_vm2, %v7525_v59  ;;  %v3622_v57 = vcombine.low %v3613_v39, %v3620_v30  ;;  %v3874_v62 = vcombine.low %v3866_v23, %v3873_v14  ;;  %v7695_v39 = vld [vmem:[#allocation4_spill] sm:$0xff]  ;;  %v7702_v14 = vld [vmem:[#allocation27_spill] sm:$0xff] }
 0x103   : > { %v4153_v30 = vcombine.low %v7695_v39, %v6304_v9  ;;  %v7696_v9 = vld [vmem:[#allocation32_spill] sm:$0xff] }
 0x104   : > { %v3636_v4 = vrot.slane %v3622_v57, %v5384_v7  ;;  %v3883_v57 = vrot.slane %v3875_v31, %v5384_v7 }
 0x105   : > { %v4160_v60 = vrot.slane %v4153_v30, %v5384_v7 }
 0x106   : > { %v3637_v49 = vcombine.low %v3629_v48, %v3636_v4  ;;  %v3782_v4 = vshrl.u32 %v6914_v5, 16 }
 0x107   : > { %v6972_v53 = vpop.f32.mrf.mxu0  ;;  %v4161_v31 = vcombine.low %v7703_v26, %v4160_v60 }
 0x108   : > { %5104 = vmatmul.mubr.msk.bf16.gmra.mxu1 %vm1336_vm0, %v3309_v3  ;;  %v7029_v3 = vcombine.high %v6914_v5, %v6914_v5 }
 0x109   : > { %v4939_v19 = vpop.f32.mrf.mxu0  ;;  %5130 = vmatmul.mubr.msk.bf16.gmra.mxu0 %vm1336_vm0, %v3596_v54  ;;  %5107 = vmatprep.mubr.msk.bf16.mxu1 %vm5301_vm2, %v7525_v59 }
 0x10a   : > { %5133 = vmatprep.mubr.msk.bf16.mxu0 %vm5301_vm2, %v7525_v59  ;;  %v3795_v58 = vshll.u32 %v7029_v3, 16  ;;  %v3798_v5 = vshrl.u32 %v7029_v3, 16 }
 0x10b   : > { %v6982_v51 = vpop.f32.mrf.mxu0 }
 0x10d   : > { %v4940_v6 = vpop.f32.mrf.mxu0 }
 0x10e   : > { %v7697_v6 = vcombine.low %v6433_v35, %v7696_v9 }
 0x110   : > { %5108 = vmatmul.mubr.msk.bf16.gmra.mxu1 %vm1336_vm0, %v3323_v47 }
 0x111   : > { %5134 = vmatmul.mubr.msk.bf16.gmra.mxu0 %vm1336_vm0, %v3637_v49  ;;  %5143 = vmatprep.mubr.msk.bf16.mxu1 %vm5301_vm2, %v7525_v59  ;;  %v7046_v49 = vcombine.high %v6926_v25, %v6926_v25 }
 0x112   : > { %5137 = vmatprep.mubr.msk.bf16.mxu0 %vm5301_vm2, %v7525_v59 }
 0x113   : > { %v3803_v39 = vshll.u32 %v7046_v49, 16  ;;  %v3806_v30 = vshrl.u32 %v7046_v49, 16 }
 0x115   : > { %v6999_v36 = vpop.f32.mrf.mxu1 }
 0x117   : > { %v4955_v20 = vpop.f32.mrf.mxu1 }
 0x118   : > { %5144 = vmatmul.mubr.msk.bf16.vlgmr.msra.gmra.mxu1 %vm1336_vm0, %v3857_v44  ;;  %v7693_v44 = vld [vmem:[#allocation18_spill] sm:$0xff]  ;;  %v7701_v20 = vld [vmem:[#allocation44_spill] sm:$0xff] }
 0x119   : > { %v7006_v15 = vpop.f32.mrf.mxu1  ;;  %5138 = vmatmul.mubr.msk.bf16.gmra.mxu0 %vm1336_vm0, %v3651_v63  ;;  %5147 = vmatprep.mubr.msk.bf16.mxu1 %vm5301_vm2, %v7525_v59  ;;  %v3876_v33 = vcombine.low %v7694_v34, %v7693_v44  ;;  %v7700_v63 = vld [vmem:[#allocation46_spill] sm:$0xff]  ;;  %v3814_v44 = vshrl.u32 %v6935_v10, 16  ;;  %v3819_v34 = vshll.u32 %v6938_v13, 16 }
 0x11a   : > { %5173 = vmatprep.mubr.msk.bf16.mxu0 %vm5301_vm2, %v7525_v59  ;;  %v3893_v23 = vcombine.low %v7701_v20, %v7700_v63 }
 0x11b   : > { %v4956_v18 = vpop.f32.mrf.mxu1  ;;  %v3890_v19 = vrot.slane %v3876_v33, %v5384_v7 }
 0x11c   : > { %v4162_v18 = vcombine.low %v7702_v14, %v6377_v43  ;;  %v3789_v43 = vsel %vm5418_vm15, %v3782_v4, %v3787_v61  ;;  %v3907_v60 = vrot.slane %v3893_v23, %v5384_v7  ;;  %v3805_v4 = vsel %vm5418_vm15, %v3798_v5, %v3803_v39 }
 0x11d   : > { %v3891_v11 = vcombine.low %v3883_v57, %v3890_v19  ;;  %v3797_v57 = vsel %vm5418_vm15, %v3790_v17, %v3795_v58  ;;  %v3900_v19 = vrot.slane %v3892_v12, %v5384_v7  ;;  %v3960_v5 = vrot.slane %v3950_v45, %v5384_v7 }
 0x11e   : > { %v7019_v21 = vpop.f32.mrf.mxu1  ;;  %v4169_v9 = vrot.slane %v4162_v18, %v5384_v7  ;;  %v3951_v17 = vcombine.low %v3789_v43, %v3797_v57 }
 0x11f   : > { %v3908_v58 = vcombine.low %v3900_v19, %v3907_v60 }
 0x120   : > { %v4959_v54 = vpop.f32.mrf.mxu1  ;;  %5148 = vmatmul.mubr.msk.bf16.gmra.mxu1 %vm1336_vm0, %v3874_v62  ;;  %v3811_v62 = vshll.u32 %v6935_v10, 16  ;;  %v4170_v52 = vcombine.low %v6668_v27, %v4169_v9  ;;  %v3967_v12 = vrot.slane %v3951_v17, %v5384_v7 }
 0x121   : > { %v7031_v8 = vpop.f32.mrf.mxu0  ;;  %5174 = vmatmul.mubr.msk.bf16.vlgmr.msra.gmra.mxu0 %vm1336_vm0, %v7697_v6  ;;  %5151 = vmatprep.mubr.msk.bf16.mxu1 %vm5301_vm2, %v7525_v59  ;;  %v3822_v54 = vshrl.u32 %v6938_v13, 16  ;;  %v3821_v6 = vsel %vm5418_vm15, %v3814_v44, %v3819_v34  ;;  %v4199_v44 = vcombine.low %v7046_v49, %v6935_v10  ;;  %v4200_v34 = vcombine.low %v6938_v13, %v6989_v50 }
 0x122   : > { %v1443_v48 = vpop.f32.mrf.mxu1  ;;  %5177 = vmatprep.mubr.msk.bf16.mxu0 %vm5301_vm2, %v7525_v59  ;;  %v3982_v46 = vcombine.low %v3960_v5, %v3967_v12 }
 0x123   : > { %v4943_v47 = vpop.f32.mrf.mxu0  ;;  %v3827_v48 = vshll.u32 %v6989_v50, 16  ;;  %v4221_v0 = vrot.slane %v4199_v44, %v5384_v7  ;;  %v4228_v56 = vrot.slane %v4200_v34, %v5384_v7 }
 0x124   : > { %v4960_v35 = vpop.f32.mrf.mxu1  ;;  %v3813_v47 = vsel %vm5418_vm15, %v3806_v30, %v3811_v62 }
 0x125   : > { %v7054_v32 = vpop.f32.mrf.mxu0  ;;  %v3829_v61 = vsel %vm5418_vm15, %v3822_v54, %v3827_v48  ;;  %v3952_v35 = vcombine.low %v3805_v4, %v3813_v47  ;;  %v3990_v54 = vrot.slane %v3982_v46, %v5384_v7  ;;  %v3830_v48 = vshrl.u32 %v6989_v50, 16  ;;  %v7704_v50 = vld [vmem:[#allocation28_spill] sm:$0xff] }
 0x126   : > { %v3953_v24 = vcombine.low %v3821_v6, %v3829_v61  ;;  %v7705_v43 = vcombine.low %v7704_v50, %v6519_v37  ;;  %v4230_v47 = vcombine.low %v4221_v0, %v4228_v56 }
 0x127   : > { %v4944_v33 = vpop.f32.mrf.mxu0  ;;  %v3974_v23 = vrot.slane %v3952_v35, %v5384_v7 }
 0x128   : > { %5152 = vmatmul.mubr.msk.bf16.gmra.mxu1 %vm1336_vm0, %v3891_v11  ;;  %v3981_v14 = vrot.slane %v3953_v24, %v5384_v7  ;;  %v4198_v11 = vcombine.low %v6926_v25, %v7029_v3  ;;  %v4244_v12 = vrot.slane %v4230_v47, %v5384_v7 }
 0x129   : > { %5178 = vmatmul.mubr.msk.bf16.gmra.mxu0 %vm1336_vm0, %v4161_v31  ;;  %5155 = vmatprep.mubr.msk.bf16.mxu1 %vm5301_vm2, %v7525_v59  ;;  %v7113_v31 = vcombine.high %v6938_v13, %v6938_v13 }
 0x12a   : > { %5181 = vmatprep.mubr.msk.bf16.mxu0 %vm5301_vm2, %v7525_v59  ;;  %v3983_v62 = vcombine.low %v3974_v23, %v3981_v14  ;;  %v4214_v13 = vrot.slane %v4198_v11, %v5384_v7 }
 0x12b   : > { %v3835_v55 = vshll.u32 %v7113_v31, 16  ;;  %v4252_v44 = vrot.slane %v7113_v31, %v5384_v7 }
 0x12c   : > { %v3997_v10 = vrot.slane %v3983_v62, %v5384_v7 }
 0x12d   : > { %v3837_v6 = vsel %vm5418_vm15, %v3830_v48, %v3835_v55  ;;  %v4259_v48 = vrot.slane %v4252_v44, %v5384_v7 }
 0x12e   : > { %v3998_v19 = vcombine.low %v3990_v54, %v3997_v10  ;;  %v4005_v35 = vrot.slane %v3837_v6, %v5384_v7 }
 0x12f   : > { %v7097_v63 = vpop.f32.mrf.mxu0 }
 0x130   : > { %v1815_v20 = vpop.f32.mrf.mxu1  ;;  %5156 = vmatmul.mubr.msk.bf16.gmra.mxu1 %vm1336_vm0, %v3908_v58 }
 0x131   : > { %5182 = vmatmul.mubr.msk.bf16.gmra.mxu0 %vm1336_vm0, %v4170_v52  ;;  %v4947_v18 = vpop.f32.mrf.mxu0  ;;  %5159 = vmatprep.mubr.msk.bf16.mxu1 %vm5301_vm2, %v7525_v59  ;;  %v1816_v33 = vadd.f32 %v1815_v20, %v6891_v40  ;;  %v4207_v40 = vrot.slane %v4785_v1, %v5384_v7  ;;  %v7706_v52 = vld [vmem:[#allocation21_spill] sm:$0xff] }
 0x132   : > { %v4965_v27 = vpop.f32.mrf.mxu1  ;;  %5185 = vmatprep.mubr.msk.bf16.mxu0 %vm5301_vm2, %v7525_v59 }
 0x133   : > { %v7107_v2 = vpop.f32.mrf.mxu0  ;;  %v4229_v4 = vcombine.low %v4207_v40, %v4214_v13 }
 0x134   : > { %v1818_v45 = vpop.f32.mrf.mxu1 }
 0x135   : > { %v4948_v26 = vpop.f32.mrf.mxu0  ;;  %v1819_v29 = vadd.f32 %v1818_v45, %v6894_v38  ;;  %v4237_v5 = vrot.slane %v4229_v4, %v5384_v7 }
 0x136   : > { %v4966_v39 = vpop.f32.mrf.mxu1 }
 0x137   : > { %v4245_v46 = vcombine.low %v4237_v5, %v4244_v12 }
 0x138   : > { %v1823_v25 = vpop.f32.mrf.mxu1  ;;  %5160 = vmatmul.mubr.msk.bf16.gmra.mxu1 %vm1336_vm0, %v3949_v22 }
 0x139   : > { %v2241_v30 = vpop.f32.mrf.mxu0  ;;  %v1824_v49 = vadd.f32 %v1823_v25, %v6972_v53  ;;  %5186 = vmatmul.mubr.msk.bf16.gmra.mxu0 %vm1336_vm0, %v7705_v43  ;;  %5163 = vmatprep.mubr.msk.bf16.mxu1 %vm5301_vm2, %v7525_v59 }
 0x13a   : > { %v7122_v3 = vadd.f32 %v2241_v30, %v1816_v33  ;;  %v4969_v22 = vpop.f32.mrf.mxu1  ;;  %5189 = vmatprep.mubr.msk.bf16.mxu0 %vm5301_vm2, %v7525_v59 }
 0x13b   : > { %v4995_v57 = vpop.f32.mrf.mxu0 }
 0x13c   : > { %v1826_v37 = vpop.f32.mrf.mxu1 }
 0x13d   : > { %v2244_v1 = vpop.f32.mrf.mxu0  ;;  %v1827_v60 = vadd.f32 %v1826_v37, %v6982_v51  ;;  %v7707_v51 = vcombine.low %v7706_v52, %v6583_v42  ;;  %v4012_v42 = vrot.slane %v4005_v35, %v5384_v7 }
 0x13e   : > { %v7147_v53 = vadd.f32 %v2244_v1, %v1819_v29  ;;  %v4970_v61 = vpop.f32.mrf.mxu1 }
 0x13f   : > { %v4996_v9 = vpop.f32.mrf.mxu0 }
 0x140   : > { %v1831_v38 = vpop.f32.mrf.mxu1  ;;  %5164 = vmatmul.mubr.msk.bf16.gmra.mxu1 %vm1336_vm0, %v3998_v19 }
 0x141   : > { %v2249_v17 = vpop.f32.mrf.mxu0  ;;  %v1832_v24 = vadd.f32 %v1831_v38, %v7031_v8  ;;  %5190 = vmatmul.mubr.msk.bf16.gmra.mxu0 %vm1336_vm0, %v7707_v51  ;;  %5167 = vmatprep.mubr.msk.bf16.mxu1 %vm5301_vm2, %v7525_v59 }
 0x142   : > { %v7152_v58 = vadd.f32 %v2249_v17, %v1824_v49  ;;  %v4973_v20 = vpop.f32.mrf.mxu1  ;;  %5193 = vmatprep.mubr.msk.bf16.mxu0 %vm5301_vm2, %v7525_v59 }
 0x143   : > { %v4999_v41 = vpop.f32.mrf.mxu0 }
 0x144   : > { %v1834_v14 = vpop.f32.mrf.mxu1 }
 0x145   : > { %v2252_v23 = vpop.f32.mrf.mxu0  ;;  %v1835_v18 = vadd.f32 %v1834_v14, %v7054_v32 }
 0x146   : > { %v7167_v8 = vadd.f32 %v2252_v23, %v1827_v60  ;;  %v4974_v45 = vpop.f32.mrf.mxu1 }
 0x147   : > { %v5000_v27 = vpop.f32.mrf.mxu0 }
 0x148   : > { %v1839_v62 = vpop.f32.mrf.mxu1  ;;  %5168 = vmatmul.mubr.msk.bf16.gmra.mxu1 %vm1336_vm0, %v4012_v42 }
 0x149   : > { %v1840_v11 = vadd.f32 %v1839_v62, %v7097_v63  ;;  %v2257_v26 = vpop.f32.mrf.mxu0  ;;  %5194 = vmatmul.mubr.msk.bf16.gmra.mxu0 %vm1336_vm0, %v4245_v46 }
 0x14a   : > { %v7176_v34 = vadd.f32 %v2257_v26, %v1832_v24  ;;  %v4977_v33 = vpop.f32.mrf.mxu1  ;;  %5197 = vmatprep.mubr.msk.bf16.mxu0 %vm5301_vm2, %v7525_v59 }
 0x14b   : > { %v5003_v32 = vpop.f32.mrf.mxu0 }
 0x14c   : > { %v1842_v39 = vpop.f32.mrf.mxu1 }
 0x14d   : > { %v1843_v30 = vadd.f32 %v1842_v39, %v7107_v2  ;;  %v2260_v54 = vpop.f32.mrf.mxu0 }
 0x14e   : > { %v7182_v63 = vadd.f32 %v2260_v54, %v1835_v18  ;;  %v4978_v25 = vpop.f32.mrf.mxu1 }
 0x14f   : > { %v5004_v10 = vpop.f32.mrf.mxu0 }
 0x150   : > { %v1847_v40 = vpop.f32.mrf.mxu1 }
 0x151   : > { %v2265_v13 = vpop.f32.mrf.mxu0  ;;  %5198 = vmatmul.mubr.msk.bf16.gmra.mxu0 %vm1336_vm0, %v4259_v48  ;;  %v1848_v7 = vadd.f32 %v1847_v40, %v6940_v28 }
 0x152   : > { %v7185_v31 = vadd.f32 %v2265_v13, %v1840_v11  ;;  %v4981_v49 = vpop.f32.mrf.mxu1 }
 0x153   : > { %v5007_v50 = vpop.f32.mrf.mxu0 }
 0x154   : > { %v1850_v59 = vpop.f32.mrf.mxu1 }
 0x155   : > { %v2268_v43 = vpop.f32.mrf.mxu0  ;;  %v1851_v37 = vadd.f32 %v1850_v59, %v6951_v16 }
 0x156   : > { %v7187_v57 = vadd.f32 %v2268_v43, %v1843_v30  ;;  %v4982_v2 = vpop.f32.mrf.mxu1 }
 0x157   : > { %v5008_v55 = vpop.f32.mrf.mxu0 }
 0x158   : > { %v1855_v0 = vpop.f32.mrf.mxu1 }
 0x159   : > { %v2273_v56 = vpop.f32.mrf.mxu0  ;;  %v1856_v47 = vadd.f32 %v1855_v0, %v6999_v36 }
 0x15a   : > { %v7190_v29 = vadd.f32 %v2273_v56, %v1848_v7  ;;  %v4985_v22 = vpop.f32.mrf.mxu1 }
 0x15b   : > { %v5011_v1 = vpop.f32.mrf.mxu0 }
 0x15c   : > { %v1858_v19 = vpop.f32.mrf.mxu1 }
 0x15d   : > { %v2276_v60 = vpop.f32.mrf.mxu0  ;;  %v1859_v24 = vadd.f32 %v1858_v19, %v7006_v15 }
 0x15e   : > { %v7193_v9 = vadd.f32 %v2276_v60, %v1851_v37  ;;  %v4986_v6 = vpop.f32.mrf.mxu1 }
 0x15f   : > { %v5012_v4 = vpop.f32.mrf.mxu0 }
 0x160   : > { %v1863_v61 = vpop.f32.mrf.mxu1 }
 0x161   : > { %v2281_v17 = vpop.f32.mrf.mxu0  ;;  %v1864_v12 = vadd.f32 %v1863_v61, %v7019_v21 }
 0x162   : > { %v7196_v38 = vadd.f32 %v2281_v17, %v1856_v47  ;;  %v4989_v28 = vpop.f32.mrf.mxu1 }
 0x163   : > { %v5015_v35 = vpop.f32.mrf.mxu0 }
 0x164   : > { %v1866_v52 = vpop.f32.mrf.mxu1 }
 0x165   : > { %v2284_v51 = vpop.f32.mrf.mxu0 }
 0x166   : > { %v7199_v41 = vadd.f32 %v2284_v51, %v1859_v24  ;;  %v4990_v16 = vpop.f32.mrf.mxu1 }
 0x167   : > { %v5016_v5 = vpop.f32.mrf.mxu0 }
 0x168   : > { %v2609_v20 = vpop.f32.mrf.mxu1 }
 0x169   : > { %v2289_v23 = vpop.f32.mrf.mxu0  ;;  %v2663_v36 = vadd.f32 %v2609_v20, %v7122_v3 }
 0x16a   : > { %v7203_v14 = vadd.f32 %v2289_v23, %v1864_v12  ;;  %v5025_v42 = vpop.f32.mrf.mxu1 }
 0x16b   : > { %v5019_v18 = vpop.f32.mrf.mxu0 }
 0x16c   : > { %v2612_v27 = vpop.f32.mrf.mxu1 }
 0x16d   : > { %v2292_v46 = vpop.f32.mrf.mxu0  ;;  %v2664_v15 = vadd.f32 %v2612_v27, %v7147_v53 }
 0x16e   : > { %v5026_v45 = vpop.f32.mrf.mxu1 }
 0x16f   : > { %v5020_v62 = vpop.f32.mrf.mxu0 }
 0x170   : > { %v2617_v11 = vpop.f32.mrf.mxu1 }
 0x171   : > { %v2665_v26 = vadd.f32 %v2617_v11, %v7152_v58  ;;  %v3106_v44 = vpop.f32.mrf.mxu0 }
 0x172   : > { %v7207_v33 = vadd.f32 %v3106_v44, %v2663_v36  ;;  %v5029_v21 = vpop.f32.mrf.mxu1 }
 0x173   : > { %v5055_v32 = vpop.f32.mrf.mxu0 }
 0x174   : > { %v2620_v39 = vpop.f32.mrf.mxu1 }
 0x175   : > { %v2666_v3 = vadd.f32 %v2620_v39, %v7167_v8  ;;  %v3109_v30 = vpop.f32.mrf.mxu0 }
 0x176   : > { %v7210_v54 = vadd.f32 %v3109_v30, %v2664_v15  ;;  %v5030_v48 = vpop.f32.mrf.mxu1 }
 0x177   : > { %v5056_v25 = vpop.f32.mrf.mxu0 }
 0x178   : > { %v2625_v10 = vpop.f32.mrf.mxu1 }
 0x179   : > { %v2667_v53 = vadd.f32 %v2625_v10, %v7176_v34  ;;  %v3114_v40 = vpop.f32.mrf.mxu0 }
 0x17a   : > { %v7213_v13 = vadd.f32 %v3114_v40, %v2665_v26  ;;  %v5033_v58 = vpop.f32.mrf.mxu1 }
 0x17b   : > { %v5059_v49 = vpop.f32.mrf.mxu0 }
 0x17c   : > { %v2628_v50 = vpop.f32.mrf.mxu1 }
 0x17d   : > { %v2668_v59 = vadd.f32 %v2628_v50, %v7182_v63  ;;  %v3117_v43 = vpop.f32.mrf.mxu0 }
 0x17e   : > { %v7216_v2 = vadd.f32 %v3117_v43, %v2666_v3  ;;  %v5034_v8 = vpop.f32.mrf.mxu1 }
 0x17f   : > { %v5060_v55 = vpop.f32.mrf.mxu0 }
 0x180   : > { %v2633_v7 = vpop.f32.mrf.mxu1 }
 0x181   : > { %v2669_v0 = vadd.f32 %v2633_v7, %v7185_v31  ;;  %v3122_v56 = vpop.f32.mrf.mxu0 }
 0x182   : > { %v7219_v22 = vadd.f32 %v3122_v56, %v2667_v53  ;;  %v5037_v34 = vpop.f32.mrf.mxu1 }
 0x183   : > { %v5063_v1 = vpop.f32.mrf.mxu0 }
 0x184   : > { %v2636_v37 = vpop.f32.mrf.mxu1 }
 0x185   : > { %v2670_v19 = vadd.f32 %v2636_v37, %v7187_v57  ;;  %v3125_v60 = vpop.f32.mrf.mxu0 }
 0x186   : > { %v7222_v6 = vadd.f32 %v3125_v60, %v2668_v59  ;;  %v5038_v63 = vpop.f32.mrf.mxu1 }
 0x187   : > { %v5064_v4 = vpop.f32.mrf.mxu0 }
 0x188   : > { %v2641_v47 = vpop.f32.mrf.mxu1 }
 0x189   : > { %v2671_v61 = vadd.f32 %v2641_v47, %v7190_v29  ;;  %v3130_v17 = vpop.f32.mrf.mxu0 }
 0x18a   : > { %v7225_v28 = vadd.f32 %v3130_v17, %v2669_v0  ;;  %v5041_v31 = vpop.f32.mrf.mxu1 }
 0x18b   : > { %v5067_v35 = vpop.f32.mrf.mxu0 }
 0x18c   : > { %v2644_v24 = vpop.f32.mrf.mxu1 }
 0x18d   : > { %v2672_v52 = vadd.f32 %v2644_v24, %v7193_v9  ;;  %v3133_v51 = vpop.f32.mrf.mxu0 }
 0x18e   : > { %v7228_v16 = vadd.f32 %v3133_v51, %v2670_v19  ;;  %v5042_v57 = vpop.f32.mrf.mxu1 }
 0x18f   : > { %v5068_v5 = vpop.f32.mrf.mxu0 }
 0x190   : > { %v2649_v12 = vpop.f32.mrf.mxu1 }
 0x191   : > { %v2673_v20 = vadd.f32 %v2649_v12, %v7196_v38  ;;  %v3138_v23 = vpop.f32.mrf.mxu0 }
 0x192   : > { %v7231_v36 = vadd.f32 %v3138_v23, %v2671_v61  ;;  %v5045_v29 = vpop.f32.mrf.mxu1 }
 0x193   : > { %v5071_v42 = vpop.f32.mrf.mxu0 }
 0x194   : > { %v2652_v18 = vpop.f32.mrf.mxu1 }
 0x195   : > { %v2674_v27 = vadd.f32 %v2652_v18, %v7199_v41  ;;  %v3141_v46 = vpop.f32.mrf.mxu0 }
 0x196   : > { %v7234_v15 = vadd.f32 %v3141_v46, %v2672_v52  ;;  %v5046_v9 = vpop.f32.mrf.mxu1 }
 0x197   : > { %v5072_v45 = vpop.f32.mrf.mxu0 }
 0x198   : > { %v2657_v62 = vpop.f32.mrf.mxu1 }
 0x199   : > { %v2675_v11 = vadd.f32 %v2657_v62, %v7203_v14  ;;  %v3146_v26 = vpop.f32.mrf.mxu0 }
 0x19a   : > { %v7237_v44 = vadd.f32 %v3146_v26, %v2673_v20  ;;  %v5049_v38 = vpop.f32.mrf.mxu1 }
 0x19b   : > { %v5075_v21 = vpop.f32.mrf.mxu0 }
 0x19c   : > { %v2660_v32 = vpop.f32.mrf.mxu1 }
 0x19d   : > { %v3149_v39 = vpop.f32.mrf.mxu0 }
 0x19e   : > { %v7239_v3 = vadd.f32 %v3149_v39, %v2674_v27  ;;  %v5050_v30 = vpop.f32.mrf.mxu1 }
 0x19f   : > { %v5076_v48 = vpop.f32.mrf.mxu0 }
 0x1a0   : > { %v3385_v41 = vpop.f32.mrf.mxu1 }
 0x1a1   : > { %v3154_v25 = vpop.f32.mrf.mxu0 }
 0x1a2   : > { %v7241_v10 = vadd.f32 %v3154_v25, %v2675_v11  ;;  %v5085_v53 = vpop.f32.mrf.mxu1 }
 0x1a3   : > { %v5079_v40 = vpop.f32.mrf.mxu0 }
 0x1a4   : > { %v3388_v58 = vpop.f32.mrf.mxu1 }
 0x1a5   : > { %v3157_v49 = vpop.f32.mrf.mxu0 }
 0x1a6   : > { %v5086_v14 = vpop.f32.mrf.mxu1 }
 0x1a7   : > { %v5080_v50 = vpop.f32.mrf.mxu0 }
 0x1a8   : > { %v7243_v59 = vpop.f32.mrf.mxu1 }
 0x1a9   : > { %v3713_v43 = vpop.f32.mrf.mxu0 }
 0x1aa   : > { %v5089_v8 = vpop.f32.mrf.mxu1 }
 0x1ab   : > { %v5115_v55 = vpop.f32.mrf.mxu0 }
 0x1ac   : > { %v7245_v7 = vpop.f32.mrf.mxu1 }
 0x1ad   : > { %v3716_v0 = vpop.f32.mrf.mxu0 }
 0x1ae   : > { %v5090_v56 = vpop.f32.mrf.mxu1 }
 0x1af   : > { %v5116_v34 = vpop.f32.mrf.mxu0 }
 0x1b0   : > { %v7247_v1 = vpop.f32.mrf.mxu1  ;;  %v3439_v34 = vadd.f32 %v3385_v41, %v7207_v33 }
 0x1b1   : > { %v7249_v37 = vpop.f32.mrf.mxu0 }
 0x1b2   : > { %v5093_v19 = vpop.f32.mrf.mxu1 }
 0x1b3   : > { %v5119_v60 = vpop.f32.mrf.mxu0 }
 0x1b4   : > { %v7251_v63 = vpop.f32.mrf.mxu1 }
 0x1b5   : > { %v7253_v4 = vpop.f32.mrf.mxu0 }
 0x1b6   : > { %v5094_v47 = vpop.f32.mrf.mxu1 }
 0x1b7   : > { %v5120_v61 = vpop.f32.mrf.mxu0  ;;  %v3767_v47 = vadd.f32 %v3713_v43, %v3439_v34  ;;  %v7296_v43 = vld [vmem:[%s7389_s2] ss:$0 sm:$0xff] }
 0x1b8   : > { %v7255_v17 = vpop.f32.mrf.mxu1 }
 0x1b9   : > { %v7257_v31 = vpop.f32.mrf.mxu0 }
 0x1ba   : > { %v5097_v35 = vpop.f32.mrf.mxu1 }
 0x1bb   : > { %v5123_v24 = vpop.f32.mrf.mxu0 }
 0x1bc   : > { %v7259_v52 = vpop.f32.mrf.mxu1  ;;  %v3440_v24 = vadd.f32 %v3388_v58, %v7210_v54 }
 0x1bd   : > { %v7261_v51 = vpop.f32.mrf.mxu0 }
 0x1be   : > { %v5098_v57 = vpop.f32.mrf.mxu1 }
 0x1bf   : > { %v5124_v5 = vpop.f32.mrf.mxu0 }
 0x1c0   : > { %v7263_v12 = vpop.f32.mrf.mxu1 }
 0x1c1   : > { %v7265_v20 = vpop.f32.mrf.mxu0 }
 0x1c2   : > { %v5101_v23 = vpop.f32.mrf.mxu1 }
 0x1c3   : > { %v5127_v29 = vpop.f32.mrf.mxu0 }
 0x1c4   : > { %v7267_v42 = vpop.f32.mrf.mxu1  ;;  %v3768_v29 = vadd.f32 %v3716_v0, %v3440_v24 }
 0x1c5   : > { %v7269_v18 = vpop.f32.mrf.mxu0 }
 0x1c6   : > { %v5102_v27 = vpop.f32.mrf.mxu1 }
 0x1c7   : > { %v5128_v46 = vpop.f32.mrf.mxu0 }
 0x1c8   : > { %v7271_v9 = vpop.f32.mrf.mxu1 }
 0x1c9   : > { %v7273_v45 = vpop.f32.mrf.mxu0 }
 0x1ca   : > { %v5105_v62 = vpop.f32.mrf.mxu1 }
 0x1cb   : > { %v5131_v11 = vpop.f32.mrf.mxu0 }
 0x1cc   : > { %v7275_v26 = vpop.f32.mrf.mxu1  ;;  %v3441_v11 = vadd.f32 %v7243_v59, %v7213_v13 }
 0x1cd   : > { %v7277_v38 = vpop.f32.mrf.mxu0 }
 0x1ce   : > { %v5106_v21 = vpop.f32.mrf.mxu1  ;;  %v3769_v58 = vadd.f32 %v7249_v37, %v3441_v11 }
 0x1cf   : > { %v5132_v32 = vpop.f32.mrf.mxu0 }
 0x1d0   : > { %v7279_v39 = vpop.f32.mrf.mxu1 }
 0x1d1   : > { %v7281_v30 = vpop.f32.mrf.mxu0 }
 0x1d2   : > { %v5109_v48 = vpop.f32.mrf.mxu1 }
 0x1d3   : > { %v5135_v25 = vpop.f32.mrf.mxu0 }
 0x1d4   : > { %v3436_v53 = vpop.f32.mrf.mxu1  ;;  %v3442_v25 = vadd.f32 %v7245_v7, %v7216_v2  ;;  %v3443_v2 = vadd.f32 %v7247_v1, %v7219_v22 }
 0x1d5   : > { %v7283_v40 = vpop.f32.mrf.mxu0 }
 0x1d6   : > { %v5110_v49 = vpop.f32.mrf.mxu1  ;;  %v3770_v37 = vadd.f32 %v7253_v4, %v3442_v25  ;;  %v3771_v24 = vadd.f32 %v7257_v31, %v3443_v2 }
 0x1d7   : > { %v5136_v14 = vpop.f32.mrf.mxu0 }
 0x1d8   : > { %v4074_v50 = vpop.f32.mrf.mxu1  ;;  %v7305_v14 = vld [vmem:[%s7390_s3] ss:$0 sm:$0xff] }
 0x1d9   : > { %v7285_v8 = vpop.f32.mrf.mxu0  ;;  %v4128_v57 = vadd.f32 %v4074_v50, %v3767_v47 }
 0x1da   : > { %v5145_v55 = vpop.f32.mrf.mxu1 }
 0x1db   : > { %v5139_v56 = vpop.f32.mrf.mxu0 }
 0x1dc   : > { %v4077_v19 = vpop.f32.mrf.mxu1 }
 0x1dd   : > { %v3764_v60 = vpop.f32.mrf.mxu0  ;;  %v4129_v33 = vadd.f32 %v4077_v19, %v3768_v29 }
 0x1de   : > { %v5146_v61 = vpop.f32.mrf.mxu1 }
 0x1df   : > { %v5140_v35 = vpop.f32.mrf.mxu0 }
 0x1e0   : > { %v4082_v5 = vpop.f32.mrf.mxu1 }
 0x1e1   : > { %v4321_v23 = vpop.f32.mrf.mxu0  ;;  %v4130_v53 = vadd.f32 %v4082_v5, %v3769_v58 }
 0x1e2   : > { %v4375_v27 = vadd.f32 %v4321_v23, %v4128_v57  ;;  %v5149_v46 = vpop.f32.mrf.mxu1  ;;  %v3444_v23 = vadd.f32 %v7251_v63, %v7222_v6 }
 0x1e3   : > { %v5175_v62 = vpop.f32.mrf.mxu0 }
 0x1e4   : > { %v4388_v41 = vmax.f32 %v4375_v27, 0.0  ;;  %v4085_v21 = vpop.f32.mrf.mxu1 }
 0x1e5   : > { %v4324_v54 = vpop.f32.mrf.mxu0  ;;  %v4131_v60 = vadd.f32 %v4085_v21, %v3770_v37 }
 0x1e6   : > { %v4376_v0 = vadd.f32 %v4324_v54, %v4129_v33  ;;  %v5150_v32 = vpop.f32.mrf.mxu1  ;;  %v4408_v13 = vmul.f32 %v7296_v43, %v4388_v41  ;;  %v3772_v33 = vadd.f32 %v7261_v51, %v3444_v23  ;;  %v3445_v54 = vadd.f32 %v7255_v17, %v7225_v28 }
 0x1e7   : > { %v5176_v48 = vpop.f32.mrf.mxu0 }
 0x1e8   : > { %v4389_v59 = vmax.f32 %v4376_v0, 0.0  ;;  %v4090_v49 = vpop.f32.mrf.mxu1  ;;  %v4428_v19 = vadd.f32 %v7305_v14, %v4408_v13 }
 0x1e9   : > { %v4329_v50 = vpop.f32.mrf.mxu0  ;;  %v4132_v29 = vadd.f32 %v4090_v49, %v3771_v24 }
 0x1ea   : > { %v4409_v55 = vmul.f32 %v7296_v43, %v4389_v59  ;;  %v4377_v56 = vadd.f32 %v4329_v50, %v4130_v53  ;;  %v5153_v34 = vpop.f32.mrf.mxu1  ;;  %v3773_v53 = vadd.f32 %v7265_v20, %v3445_v54  ;;  %v3446_v50 = vadd.f32 %v7259_v52, %v7228_v16 }
 0x1eb   : > { %v5179_v7 = vpop.f32.mrf.mxu0 }
 0x1ec   : > { %v4429_v47 = vadd.f32 %v7305_v14, %v4409_v55  ;;  %v4390_v61 = vmax.f32 %v4377_v56, 0.0  ;;  %v4093_v35 = vpop.f32.mrf.mxu1  ;;  %v3774_v34 = vadd.f32 %v7269_v18, %v3446_v50  ;;  %v3451_v50 = vadd.f32 %v7279_v39, %v7241_v10 }
 0x1ed   : > { %v4332_v4 = vpop.f32.mrf.mxu0  ;;  %v4133_v63 = vadd.f32 %v4093_v35, %v3772_v33  ;;  %v3449_v33 = vadd.f32 %v7271_v9, %v7237_v44 }
 0x1ee   : > { %v4827_v57 = vpack.c.bf16 %v4429_v47, %v4428_v19  ;;  %v4378_v5 = vadd.f32 %v4332_v4, %v4131_v60  ;;  %v5154_v22 = vpop.f32.mrf.mxu1  ;;  %v4410_v27 = vmul.f32 %v7296_v43, %v4390_v61  ;;  %v3447_v19 = vadd.f32 %v7263_v12, %v7231_v36 }
 0x1ef   : > { %v5180_v1 = vpop.f32.mrf.mxu0 }
 0x1f0   : > { %4828 = vst [vmem:[%s7316_s10] sm:$0xff] %v4827_v57   ;;  %v4391_v46 = vmax.f32 %v4378_v5, 0.0  ;;  %v4098_v62 = vpop.f32.mrf.mxu1  ;;  %v4430_v6 = vadd.f32 %v7305_v14, %v4410_v27  ;;  %v3775_v24 = vadd.f32 %v7273_v45, %v3447_v19  ;;  %v3448_v1 = vadd.f32 %v7267_v42, %v7234_v15 }
 0x1f1   : > { %v4337_v11 = vpop.f32.mrf.mxu0  ;;  %v4134_v28 = vadd.f32 %v4098_v62, %v3773_v53 }
 0x1f2   : > { %v4411_v41 = vmul.f32 %v7296_v43, %v4391_v46  ;;  %v4379_v21 = vadd.f32 %v4337_v11, %v4132_v29  ;;  %v5157_v31 = vpop.f32.mrf.mxu1  ;;  %v3776_v46 = vadd.f32 %v7277_v38, %v3448_v1 }
 0x1f3   : > { %v5183_v58 = vpop.f32.mrf.mxu0 }
 0x1f4   : > { %v4431_v0 = vadd.f32 %v7305_v14, %v4411_v41  ;;  %v4392_v32 = vmax.f32 %v4379_v21, 0.0  ;;  %v4101_v48 = vpop.f32.mrf.mxu1 }
 0x1f5   : > { %v4340_v25 = vpop.f32.mrf.mxu0  ;;  %v4135_v52 = vadd.f32 %v4101_v48, %v3774_v34  ;;  %v3450_v48 = vadd.f32 %v7275_v26, %v7239_v3  ;;  %v3779_v34 = vadd.f32 %v7285_v8, %v3451_v50 }
 0x1f6   : > { %v4832_v51 = vpack.c.bf16 %v4431_v0, %v4430_v6  ;;  %v4380_v13 = vadd.f32 %v4340_v25, %v4133_v63  ;;  %v5158_v59 = vpop.f32.mrf.mxu1  ;;  %v4412_v17 = vmul.f32 %v7296_v43, %v4392_v32  ;;  %v3777_v6 = vadd.f32 %v7281_v30, %v3449_v33 }
 0x1f7   : > { %v5184_v49 = vpop.f32.mrf.mxu0 }
 0x1f8   : > { %4854 = vst [vmem:[%s7316_s10 + $0x8] sm:$0xff] %v4832_v51   ;;  %v4393_v37 = vmax.f32 %v4380_v13, 0.0  ;;  %v4106_v55 = vpop.f32.mrf.mxu1  ;;  %v4432_v16 = vadd.f32 %v7305_v14, %v4412_v17  ;;  %v3778_v13 = vadd.f32 %v7283_v40, %v3450_v48 }
 0x1f9   : > { %v4345_v56 = vpop.f32.mrf.mxu0  ;;  %v4136_v36 = vadd.f32 %v4106_v55, %v3775_v24 }
 0x1fa   : > { %v4413_v2 = vmul.f32 %v7296_v43, %v4393_v37  ;;  %v4381_v7 = vadd.f32 %v4345_v56, %v4134_v28  ;;  %v5161_v20 = vpop.f32.mrf.mxu1 }
 0x1fb   : > { %v5187_v60 = vpop.f32.mrf.mxu0 }
 0x1fc   : > { %v4433_v47 = vadd.f32 %v7305_v14, %v4413_v2  ;;  %v4394_v61 = vmax.f32 %v4381_v7, 0.0  ;;  %v4109_v35 = vpop.f32.mrf.mxu1 }
 0x1fd   : > { %v4348_v4 = vpop.f32.mrf.mxu0  ;;  %v4137_v42 = vadd.f32 %v4109_v35, %v3776_v46 }
 0x1fe   : > { %v4837_v18 = vpack.c.bf16 %v4433_v47, %v4432_v16  ;;  %v4382_v57 = vadd.f32 %v4348_v4, %v4135_v52  ;;  %v5162_v5 = vpop.f32.mrf.mxu1  ;;  %v4414_v12 = vmul.f32 %v7296_v43, %v4394_v61 }
 0x1ff   : > { %v5188_v22 = vpop.f32.mrf.mxu0 }
 0x200   : > { %4855 = vst [vmem:[%s7316_s10 + $0x10] sm:$0xff] %v4837_v18   ;;  %v4395_v23 = vmax.f32 %v4382_v57, 0.0  ;;  %v4114_v29 = vpop.f32.mrf.mxu1  ;;  %v4434_v15 = vadd.f32 %v7305_v14, %v4414_v12 }
 0x201   : > { %v4353_v27 = vpop.f32.mrf.mxu0  ;;  %v4138_v44 = vadd.f32 %v4114_v29, %v3777_v6 }
 0x202   : > { %v4415_v62 = vmul.f32 %v7296_v43, %v4395_v23  ;;  %v4383_v11 = vadd.f32 %v4353_v27, %v4136_v36  ;;  %v5165_v45 = vpop.f32.mrf.mxu1 }
 0x203   : > { %v5191_v41 = vpop.f32.mrf.mxu0 }
 0x204   : > { %v4435_v21 = vadd.f32 %v7305_v14, %v4415_v62  ;;  %v4396_v31 = vmax.f32 %v4383_v11, 0.0  ;;  %v4117_v54 = vpop.f32.mrf.mxu1 }
 0x205   : > { %v4356_v58 = vpop.f32.mrf.mxu0  ;;  %v4139_v26 = vadd.f32 %v4117_v54, %v3778_v13 }
 0x206   : > { %v4842_v38 = vpack.c.bf16 %v4435_v21, %v4434_v15  ;;  %v4384_v63 = vadd.f32 %v4356_v58, %v4137_v42  ;;  %v5166_v0 = vpop.f32.mrf.mxu1  ;;  %v4416_v9 = vmul.f32 %v7296_v43, %v4396_v31 }
 0x207   : > { %v5192_v32 = vpop.f32.mrf.mxu0 }
 0x208   : > { %4856 = vst [vmem:[%s7316_s10 + $0x18] sm:$0xff] %v4842_v38   ;;  %v4397_v25 = vmax.f32 %v4384_v63, 0.0  ;;  %v4122_v53 = vpop.f32.mrf.mxu1  ;;  %v4436_v3 = vadd.f32 %v7305_v14, %v4416_v9 }
 0x209   : > { %v4361_v51 = vpop.f32.mrf.mxu0  ;;  %v4140_v19 = vadd.f32 %v4122_v53, %v3779_v34 }
 0x20a   : > { %v4417_v59 = vmul.f32 %v7296_v43, %v4397_v25  ;;  %v4385_v30 = vadd.f32 %v4361_v51, %v4138_v44  ;;  %v5169_v49 = vpop.f32.mrf.mxu1 }
 0x20b   : > { %v5195_v28 = vpop.f32.mrf.mxu0 }
 0x20c   : > { %v4437_v17 = vadd.f32 %v7305_v14, %v4417_v59  ;;  %v4398_v37 = vmax.f32 %v4385_v30, 0.0  ;;  %v4125_v55 = vpop.f32.mrf.mxu1 }
 0x20d   : > { %v4364_v56 = vpop.f32.mrf.mxu0 }
 0x20e   : > { %v4847_v40 = vpack.c.bf16 %v4437_v17, %v4436_v3  ;;  %v4386_v2 = vadd.f32 %v4364_v56, %v4139_v26  ;;  %v5170_v7 = vpop.f32.mrf.mxu1  ;;  %v4418_v10 = vmul.f32 %v7296_v43, %v4398_v37 }
 0x20f   : > { %v5196_v20 = vpop.f32.mrf.mxu0 }
 0x210   : > { %4857 = vst [vmem:[%s7316_s10 + $0x20] sm:$0xff] %v4847_v40   ;;  %v4399_v39 = vmax.f32 %v4386_v2, 0.0  ;;  %v4438_v61 = vadd.f32 %v7305_v14, %v4418_v10 }
 0x211   : > { %v4369_v60 = vpop.f32.mrf.mxu0 }
 0x212   : > { %v4419_v16 = vmul.f32 %v7296_v43, %v4399_v39  ;;  %v4387_v52 = vadd.f32 %v4369_v60, %v4140_v19 }
 0x213   : > { %v5199_v47 = vpop.f32.mrf.mxu0 }
 0x214   : > { %v4439_v8 = vadd.f32 %v7305_v14, %v4419_v16  ;;  %v4400_v35 = vmax.f32 %v4387_v52, 0.0 }
 0x215   : > { %v4372_v4 = vpop.f32.mrf.mxu0 }
 0x216   : > { %v4852_v24 = vpack.c.bf16 %v4439_v8, %v4438_v61  ;;  %v4420_v18 = vmul.f32 %v7296_v43, %v4400_v35 }
 0x217   : > { %v5200_v57 = vpop.f32.mrf.mxu0 }
 0x218   : > { %4858 = vst [vmem:[%s7316_s10 + $0x28] sm:$0xff] %v4852_v24   ;;  %v4440_v5 = vadd.f32 %v7305_v14, %v4420_v18 }
 0x21a   : > { %v4823_v22 = vpack.c.bf16 %v4440_v5, %v4440_v5 }
 0x21c   : > { %4506 = vst [vmem:[%s7316_s10 + $0x30] sm:$0x1] %v4823_v22 }
 0x21d PF: > { %s14_s19 = sadd.s32 1, %s5297_s19   ;;  %s7708_s15 = smov %s5289_s17 }
 0x21e   : > { %p11_p7 = scmp.ge.s32.totalorder %s14_s19, 6   ;;  %s7709_s16 = smov %s5293_s18 }
 0x21f   : > { %s7710_s17 = smov %s7713_s20  ;;  %s7711_s18 = smov %s7717_s21 }
 0x220   :  { %13 = sbr.rel (!%p11_p7) target bundleno = 3 (0x3), region = 74 }

</bundles_post_ra>
